<compile_context>
chip_gen: v7x
topology: tpu7x:2x2x1
jax: 0.10.0
libtpu: 0.0.40
codegen_flags: <defaults>
</compile_context>

<pallas_src>
import numpy as np
import jax
import jax.numpy as jnp
from jax.experimental import pallas as pl
from jax.experimental.pallas import tpu as pltpu

K_SORT = 16            # self.k in the PyTorch module
NUM_GCN_LAYERS = 5     # 4 hidden layers + final width-1 layer
HIDDEN_DENSE = 32      # module's hidden_dense_dim
VMEM_LIMIT_GCN = 48 * 1024 * 1024    # below v7x's 64 MiB physical VMEM
VMEM_LIMIT_HEAD = 32 * 1024 * 1024


def _round_up(x, m):
    return ((x + m - 1) // m) * m


# ------------------------------------------------------------------
# Kernel 1: the whole DGCNN conv stack, grid = (layer,).
#   A^T, x^T, rowsum: constant-index full blocks  -> fetched once, resident.
#   hprev scratch (bf16) carries layer state across grid steps.
# ------------------------------------------------------------------
def _gcn_stack_kernel(a_t_ref, x_t_ref, rs_ref, wt_ref, bt_ref, out_ref, hprev_ref):
    l = pl.program_id(0)

    @pl.when(l == 0)
    def _():
        hprev_ref[...] = x_t_ref[...]

    # Aggregate first (W/bias/tanh hoisted out of the big matmul):
    #   agg = S_{l-1} @ A^T        [H, N] f32 accumulation, bf16 operands on MXU
    agg = jnp.dot(hprev_ref[...], a_t_ref[...], preferred_element_type=jnp.float32)
    #   h_l = tanh(W_l @ agg + b_l * rowsum)   (exact: rowsum carries A_norm @ 1)
    z = (jnp.dot(wt_ref[0], agg, preferred_element_type=jnp.float32)
         + bt_ref[0] * rs_ref[...])
    h_l = jnp.tanh(z)
    out_ref[...] = h_l
    hprev_ref[...] = h_l.astype(jnp.bfloat16)


def run_gcn_stack(a_t, rowsum, x, gp):
    """Run all 5 DGCNN conv layers in one pallas_call. Returns [5H, N_pad] f32."""
    h = gp['wt_all'].shape[1]
    n_pad = a_t.shape[0]
    n, f = x.shape
    # TODO(synk): for N_pad > ~4096 (resident bf16 A^T exceeds v7x VMEM) fall back
    # to a tiled / block-sparse A^T pipeline instead of the fully resident one.
    x_t = jnp.zeros((h, n_pad), jnp.float32).at[:f, :n].set(x.T).astype(jnp.bfloat16)

    return pl.pallas_call(
        _gcn_stack_kernel,
        grid=(NUM_GCN_LAYERS,),
        in_specs=[
            pl.BlockSpec((n_pad, n_pad), lambda l: (0, 0)),   # A^T: resident, DMA'd once
            pl.BlockSpec((h, n_pad), lambda l: (0, 0)),       # x^T: resident
            pl.BlockSpec((1, n_pad), lambda l: (0, 0)),       # rowsum(A_norm): resident
            pl.BlockSpec((1, h, h), lambda l: (l, 0, 0)),     # W_l (padded to [H,H])
            pl.BlockSpec((1, h, 1), lambda l: (l, 0, 0)),     # b_l (padded to [H,1])
        ],
        out_specs=pl.BlockSpec((h, n_pad), lambda l: (l, 0)),
        out_shape=jax.ShapeDtypeStruct((NUM_GCN_LAYERS * h, n_pad), jnp.float32),
        scratch_shapes=[pltpu.VMEM((h, n_pad), jnp.bfloat16)],   # previous-layer features
        compiler_params=pltpu.CompilerParams(
            dimension_semantics=("arbitrary",),   # layers are sequential (scratch carry)
            vmem_limit_bytes=VMEM_LIMIT_GCN),
    )(a_t, x_t, rowsum, gp['wt_all'], gp['bt_all'])


# ------------------------------------------------------------------
# Kernel 2: readout head, one batch block per grid step, all matmuls fused,
# three results packed into one lane-dense [blk, 128] output.
# ------------------------------------------------------------------
def _head_kernel(xf_ref, w1_ref, b1_ref, w2_ref, b2_ref, wd1_ref, bd1_ref,
                 wd2_ref, bd2_ref, out_ref):
    xf = xf_ref[...]                                             # [blk, kd_pad]
    # Conv1d(1,16,D,stride=D) + ReLU as one block-diagonal matmul.
    c1 = jnp.dot(xf, w1_ref[...], preferred_element_type=jnp.float32) + b1_ref[...]
    c1 = jnp.maximum(c1, 0.0)                                    # [blk, 256]
    # MaxPool1d(2,2): even node positions live in lanes 0:128, odd in 128:256.
    pf = jnp.maximum(c1[:, :128], c1[:, 128:])                   # [blk, 128]
    # Conv1d(16,32,5) + ReLU via im2col-folded weight (cols = co*4 + t).
    c2 = jnp.dot(pf, w2_ref[...], preferred_element_type=jnp.float32) + b2_ref[...]
    c2 = jnp.maximum(c2, 0.0)                                    # [blk, 128]
    # Linear(128,32) + ReLU.
    last = jnp.dot(c2, wd1_ref[...], preferred_element_type=jnp.float32) + bd1_ref[...]
    last = jnp.maximum(last, 0.0)                                # [blk, 32]
    # TODO(synk): Dropout(p=0.5) uses eval (identity) semantics inside the kernel.
    logits = jnp.dot(last, wd2_ref[...], preferred_element_type=jnp.float32) + bd2_ref[...]
    m = jnp.max(logits, axis=1, keepdims=True)
    lse = m + jnp.log(jnp.sum(jnp.exp(logits - m), axis=1, keepdims=True))
    logp = logits - lse                                          # [blk, T]

    # Pack (logp, logits, last) into one lane-dense [blk, 128] slab:
    # cols [0:T]=logp, [32:32+T]=logits, [64:96]=last. Single unmasked store.
    blk, t = logits.shape
    pieces = [logp]
    if t < 32:
        pieces.append(jnp.zeros((blk, 32 - t), jnp.float32))
    pieces.append(logits)
    if t < 32:
        pieces.append(jnp.zeros((blk, 32 - t), jnp.float32))
    pieces.append(last)
    pieces.append(jnp.zeros((blk, 32), jnp.float32))
    out_ref[...] = jnp.concatenate(pieces, axis=-1)


def _head_block(b):
    # Keep >= 2 grid blocks when the batch allows it (v7x has 2 TCs/chip);
    # block sublane count must be a multiple of 8 unless it spans the whole batch.
    if b <= 8:
        return b, b
    blk_b = min(64, _round_up(-(-b // 2), 8))
    return blk_b, _round_up(b, blk_b)


def run_head(pooled, hp):
    b, k, d = pooled.shape
    kd_pad = hp['w1big'].shape[0]
    xflat = pooled.reshape(b, k * d)                   # node-major flatten, as in PyG
    blk_b, b_pad = _head_block(b)
    xflat = jnp.pad(xflat, ((0, b_pad - b), (0, kd_pad - k * d)))
    t = hp['bd2'].shape[1]

    def wspec(arr):
        return pl.BlockSpec(arr.shape, lambda i: (0, 0))

    packed = pl.pallas_call(
        _head_kernel,
        grid=(b_pad // blk_b,),
        in_specs=[pl.BlockSpec((blk_b, kd_pad), lambda i: (i, 0)),
                  wspec(hp['w1big']), wspec(hp['b1big']),
                  wspec(hp['w2big']), wspec(hp['b2big']),
                  wspec(hp['wd1t']), wspec(hp['bd1']),
                  wspec(hp['wd2t']), wspec(hp['bd2'])],
        out_specs=pl.BlockSpec((blk_b, 128), lambda i: (i, 0)),
        out_shape=jax.ShapeDtypeStruct((b_pad, 128), jnp.float32),
        compiler_params=pltpu.CompilerParams(
            dimension_semantics=("parallel",),
            vmem_limit_bytes=VMEM_LIMIT_HEAD),
    )(xflat, hp['w1big'], hp['b1big'], hp['w2big'], hp['b2big'],
      hp['wd1t'], hp['bd1'], hp['wd2t'], hp['bd2'])
    logp = packed[:b, 0:t]
    out = packed[:b, 32:32 + t]
    last = packed[:b, 64:64 + HIDDEN_DENSE]
    return logp, out, last


# ------------------------------------------------------------------
# JAX glue
# ------------------------------------------------------------------
def build_adjacency_t(edge_index, num_nodes, n_pad):
    """Dense normalized adjacency of DGCNNConv, transposed + padded (bf16), plus
    its exact row sums (bias term after hoisting W out of the aggregation).

    A_norm[i, j] = (#edges j->i, incl. self loop) / out_degree_with_self(i),
    matching DGCNNConv.message(): norm = degree(src)^(-1)[dst].
    """
    # TODO(synk): for large sparse graphs replace this dense O(N^2) adjacency with
    # a scalar-prefetched block-sparse SpMM kernel.
    loop = jnp.arange(num_nodes, dtype=edge_index.dtype)
    src = jnp.concatenate([edge_index[0], loop])
    dst = jnp.concatenate([edge_index[1], loop])
    a = jnp.zeros((num_nodes, num_nodes), jnp.float32).at[dst, src].add(1.0)
    deg_src = jnp.zeros((num_nodes,), jnp.float32).at[src].add(1.0)
    a_norm = a / deg_src[:, None]
    a_t = jnp.zeros((n_pad, n_pad), jnp.float32).at[:num_nodes, :num_nodes].set(a_norm.T)
    rowsum = jnp.zeros((1, n_pad), jnp.float32).at[0, :num_nodes].set(a_norm.sum(axis=1))
    return a_t.astype(jnp.bfloat16), rowsum


def global_sort_pool(x_cat, num_graphs, nodes_per_graph, k):
    """PyG global_sort_pool for contiguous, equal-sized graphs."""
    # TODO(synk): per-graph descending sort / top-k kept in plain JAX (no clean
    # Pallas sorting primitive); all hot-path matmuls run in Pallas kernels.
    dense = x_cat.reshape(num_graphs, nodes_per_graph, x_cat.shape[-1])
    order = jnp.argsort(-dense[:, :, -1], axis=1)
    dense = jnp.take_along_axis(dense, order[:, :, None], axis=1)
    if nodes_per_graph >= k:
        return dense[:, :k, :]
    pad = jnp.zeros((num_graphs, k - nodes_per_graph, dense.shape[-1]), dense.dtype)
    return jnp.concatenate([dense, pad], axis=1)


def init_params(key, dim_features, hidden_dim, dim_target):
    assert hidden_dim % 8 == 0 and dim_features <= hidden_dim and dim_target <= 32
    h = hidden_dim
    d_total = 4 * h + 1
    keys = jax.random.split(key, 16)

    # ---- DGCNNConv stack: torch nn.Linear weight [out,in], bias [out] ----
    dims_in = [dim_features, h, h, h, h]
    dims_out = [h, h, h, h, 1]
    wt_all = np.zeros((NUM_GCN_LAYERS, h, h), np.float32)
    bt_all = np.zeros((NUM_GCN_LAYERS, h, 1), np.float32)
    for i in range(NUM_GCN_LAYERS):
        kw, kb = jax.random.split(keys[i])
        w = 0.1 * jax.random.normal(kw, (dims_out[i], dims_in[i]), jnp.float32)
        b = 0.1 * jax.random.normal(kb, (dims_out[i],), jnp.float32)
        wt_all[i, :dims_out[i], :dims_in[i]] = np.asarray(w)
        bt_all[i, :dims_out[i], 0] = np.asarray(b)
    gp = {'wt_all': jnp.asarray(wt_all), 'bt_all': jnp.asarray(bt_all)}

    # ---- readout head (torch layouts) ----
    w1 = 0.1 * jax.random.normal(keys[5], (16, 1, d_total), jnp.float32)   # Conv1d(1,16,D,D)
    b1 = 0.1 * jax.random.normal(keys[6], (16,), jnp.float32)
    w2 = 0.1 * jax.random.normal(keys[7], (32, 16, 5), jnp.float32)        # Conv1d(16,32,5)
    b2 = 0.1 * jax.random.normal(keys[8], (32,), jnp.float32)
    dense_dim = (K_SORT - 2) // 2 + 1            # 8
    n_out = dense_dim - 5 + 1                    # 4
    in_dense = n_out * 32                        # 128
    wd1 = 0.1 * jax.random.normal(keys[9], (HIDDEN_DENSE, in_dense), jnp.float32)
    bd1 = 0.1 * jax.random.normal(keys[10], (HIDDEN_DENSE,), jnp.float32)
    wd2 = 0.1 * jax.random.normal(keys[11], (dim_target, HIDDEN_DENSE), jnp.float32)
    bd2 = 0.1 * jax.random.normal(keys[12], (dim_target,), jnp.float32)

    # Fold Conv1d(1,16,D,stride=D) into a block-diagonal [K*D(pad), 256] matmul:
    # even node positions -> lanes [q*16:(q+1)*16], odd -> 128 + same range.
    kd = K_SORT * d_total
    kd_pad = _round_up(kd, 128)
    w1_np = np.asarray(w1)[:, 0, :]              # [16, D]
    w1big = np.zeros((kd_pad, 256), np.float32)
    for p in range(K_SORT):
        half = 0 if p % 2 == 0 else 128
        q = p // 2
        w1big[p * d_total:(p + 1) * d_total, half + q * 16: half + q * 16 + 16] = w1_np.T
    b1big = np.tile(np.asarray(b1), 16)[None, :]                 # [1, 256]

    # Fold Conv1d(16,32,5) im2col into one [128,128] weight; output column order
    # co*n_out + t matches PyTorch's reshape(B, -1) of [B, 32, n_out].
    w2_np = np.asarray(w2)
    w2big = np.zeros((dense_dim * 16, 32 * n_out), np.float32)
    for co in range(32):
        for t in range(n_out):
            for kk in range(5):
                w2big[(t + kk) * 16:(t + kk) * 16 + 16, co * n_out + t] = w2_np[co, :, kk]
    b2big = np.repeat(np.asarray(b2), n_out)[None, :]            # [1, 128]

    hp = {
        'w1big': jnp.asarray(w1big),             # [kd_pad, 256]
        'b1big': jnp.asarray(b1big),             # [1, 256]
        'w2big': jnp.asarray(w2big),             # [128, 128]
        'b2big': jnp.asarray(b2big),             # [1, 128]
        'wd1t': jnp.transpose(wd1),              # [128, 32]
        'bd1': bd1[None, :],                     # [1, 32]
        'wd2t': jnp.transpose(wd2),              # [32, T]
        'bd2': bd2[None, :],                     # [1, T]
    }
    return gp, hp


def _dgcnn_forward(x, edge_index, num_graphs, nodes_per_graph, gp, hp):
    n = x.shape[0]
    h = gp['wt_all'].shape[1]
    n_pad = _round_up(max(n, 128), 128)

    a_t, rowsum = build_adjacency_t(edge_index, n, n_pad)
    feats = run_gcn_stack(a_t, rowsum, x, gp)              # [5H, Npad] f32
    d_total = 4 * h + 1
    x_cat = feats[:d_total, :n].T                          # [N, 4H+1] = cat(h0..h4)
    pooled = global_sort_pool(x_cat, num_graphs, nodes_per_graph, K_SORT)
    return run_head(pooled, hp)


dgcnn_forward = jax.jit(_dgcnn_forward, static_argnums=(2, 3))


if __name__ == "__main__":
    dim_features, hidden_dim, dim_target = 4, 32, 5
    num_graphs, nodes_per_graph = 2, 20                    # 2 contiguous graphs, 20 nodes each
    n = num_graphs * nodes_per_graph

    key = jax.random.PRNGKey(0)
    kx, kp = jax.random.split(key)
    x = jax.random.normal(kx, (n, dim_features), jnp.float32)

    # undirected ring inside each graph of the batch
    edges = []
    for g in range(num_graphs):
        off = g * nodes_per_graph
        for i in range(nodes_per_graph):
            j = (i + 1) % nodes_per_graph
            edges.append((off + i, off + j))
            edges.append((off + j, off + i))
    edge_index = jnp.asarray(np.array(edges, dtype=np.int32).T)     # [2, E]

    gp, hp = init_params(kp, dim_features, hidden_dim, dim_target)

    logp, out, last = dgcnn_forward(x, edge_index, num_graphs, nodes_per_graph, gp, hp)
    jax.block_until_ready((logp, out, last))
    assert logp.shape == (num_graphs, dim_target)
    assert out.shape == (num_graphs, dim_target)
    assert last.shape == (num_graphs, HIDDEN_DENSE)
    assert bool(jnp.all(jnp.isfinite(logp)))
    assert bool(jnp.all(jnp.isfinite(out)))
    assert bool(jnp.all(jnp.isfinite(last)))
    print("KERNEL_OK")
</pallas_src>

<mosaic_0001>
module attributes {stable_mosaic.version = 11 : i64} {
  func.func @_gcn_stack_kernel(%arg0: i32, %arg1: memref<128x128xbf16, #tpu.memory_space<vmem>>, %arg2: memref<32x128xbf16, #tpu.memory_space<vmem>>, %arg3: memref<1x128xf32, #tpu.memory_space<vmem>>, %arg4: memref<1x32x32xf32, #tpu.memory_space<vmem>>, %arg5: memref<1x32x1xf32, #tpu.memory_space<vmem>>, %arg6: memref<32x128xf32, #tpu.memory_space<vmem>>, %arg7: memref<32x128xbf16, #tpu.memory_space<vmem>>) attributes {dimension_semantics = [#tpu.dimension_semantics<arbitrary>], iteration_bounds = array<i64: 5>, scalar_prefetch = 0 : i64, scratch_operands = 1 : i64, tpu.core_type = #tpu.core_type<tc>, window_params = [{pipeline_mode = #tpu.pipeline_mode<synchronous>, transform_indices = @transform_0, window_bounds = array<i64: 128, 128>}, {pipeline_mode = #tpu.pipeline_mode<synchronous>, transform_indices = @transform_1, window_bounds = array<i64: 32, 128>}, {pipeline_mode = #tpu.pipeline_mode<synchronous>, transform_indices = @transform_2, window_bounds = array<i64: 1, 128>}, {transform_indices = @transform_3, window_bounds = array<i64: 1, 32, 32>}, {transform_indices = @transform_4, window_bounds = array<i64: 1, 32, 1>}, {transform_indices = @transform_5, window_bounds = array<i64: 32, 128>}]} {
    %c0_i32 = arith.constant 0 : i32
    %0 = arith.cmpi eq, %arg0, %c0_i32 : i32
    %1 = arith.extui %0 : i1 to i32
    %c0_i32_0 = arith.constant 0 : i32
    %2 = arith.cmpi ne, %1, %c0_i32_0 : i32
    scf.if %2 {
      %c0_17 = arith.constant 0 : index
      %c0_18 = arith.constant 0 : index
      %20 = vector.load %arg2[%c0_17, %c0_18] : memref<32x128xbf16, #tpu.memory_space<vmem>>, vector<32x128xbf16>
      %c0_19 = arith.constant 0 : index
      %c0_20 = arith.constant 0 : index
      %21 = vector.load %arg7[%c0_19, %c0_20] : memref<32x128xbf16, #tpu.memory_space<vmem>>, vector<32x128xbf16>
      tpu.vector_store %arg7[%c0_19, %c0_20], %20 {strides = array<i32>} : memref<32x128xbf16, #tpu.memory_space<vmem>>, vector<32x128xbf16>,
    } else {
    }
    %c0 = arith.constant 0 : index
    %c0_1 = arith.constant 0 : index
    %3 = vector.load %arg7[%c0, %c0_1] : memref<32x128xbf16, #tpu.memory_space<vmem>>, vector<32x128xbf16>
    %c0_2 = arith.constant 0 : index
    %c0_3 = arith.constant 0 : index
    %4 = vector.load %arg1[%c0_2, %c0_3] : memref<128x128xbf16, #tpu.memory_space<vmem>>, vector<128x128xbf16>
    %cst = arith.constant dense<0.000000e+00> : vector<32x128xf32>
    %5 = tpu.matmul %3, %4, %cst {dimension_numbers = #tpu.dot_dimension_numbers<[1], [0], [0], [1], [0, 0, 1, 1], [], []>} : vector<32x128xbf16>, vector<128x128xbf16>, vector<32x128xf32> -> vector<32x128xf32>
    %c0_4 = arith.constant 0 : index
    %c0_5 = arith.constant 0 : index
    %c0_6 = arith.constant 0 : index
    %6 = vector.load %arg4[%c0_4, %c0_5, %c0_6] : memref<1x32x32xf32, #tpu.memory_space<vmem>>, vector<1x32x32xf32>
    %7 = vector.shape_cast %6 : vector<1x32x32xf32> to vector<32x32xf32>
    %cst_7 = arith.constant dense<0.000000e+00> : vector<32x128xf32>
    %8 = tpu.matmul %7, %5, %cst_7 {dimension_numbers = #tpu.dot_dimension_numbers<[1], [0], [0], [1], [0, 0, 1, 1], [], []>} : vector<32x32xf32>, vector<32x128xf32>, vector<32x128xf32> -> vector<32x128xf32>
    %c0_8 = arith.constant 0 : index
    %c0_9 = arith.constant 0 : index
    %c0_10 = arith.constant 0 : index
    %9 = vector.load %arg5[%c0_8, %c0_9, %c0_10] : memref<1x32x1xf32, #tpu.memory_space<vmem>>, vector<1x32x1xf32>
    %10 = vector.shape_cast %9 : vector<1x32x1xf32> to vector<32x1xf32>
    %c0_11 = arith.constant 0 : index
    %c0_12 = arith.constant 0 : index
    %11 = vector.load %arg3[%c0_11, %c0_12] : memref<1x128xf32, #tpu.memory_space<vmem>>, vector<1x128xf32>
    %12 = vector.broadcast %10 : vector<32x1xf32> to vector<32x128xf32>
    %13 = vector.broadcast %11 : vector<1x128xf32> to vector<32x128xf32>
    %14 = arith.mulf %12, %13 : vector<32x128xf32>
    %15 = arith.addf %8, %14 : vector<32x128xf32>
    %16 = math.tanh %15 : vector<32x128xf32>
    %c0_13 = arith.constant 0 : index
    %c0_14 = arith.constant 0 : index
    %17 = vector.load %arg6[%c0_13, %c0_14] : memref<32x128xf32, #tpu.memory_space<vmem>>, vector<32x128xf32>
    tpu.vector_store %arg6[%c0_13, %c0_14], %16 {strides = array<i32>} : memref<32x128xf32, #tpu.memory_space<vmem>>, vector<32x128xf32>,
    %18 = arith.truncf %16 : vector<32x128xf32> to vector<32x128xbf16>
    %c0_15 = arith.constant 0 : index
    %c0_16 = arith.constant 0 : index
    %19 = vector.load %arg7[%c0_15, %c0_16] : memref<32x128xbf16, #tpu.memory_space<vmem>>, vector<32x128xbf16>
    tpu.vector_store %arg7[%c0_15, %c0_16], %18 {strides = array<i32>} : memref<32x128xbf16, #tpu.memory_space<vmem>>, vector<32x128xbf16>,
    return
  }
  func.func @transform_0(%arg0: i32) -> (i32, i32) {
    %c0_i32 = arith.constant 0 : i32
    %c0_i32_0 = arith.constant 0 : i32
    %c0_i32_1 = arith.constant 0 : i32
    return %c0_i32, %c0_i32_0 : i32, i32
  }
  func.func @transform_1(%arg0: i32) -> (i32, i32) {
    %c0_i32 = arith.constant 0 : i32
    %c0_i32_0 = arith.constant 0 : i32
    %c0_i32_1 = arith.constant 0 : i32
    return %c0_i32, %c0_i32_0 : i32, i32
  }
  func.func @transform_2(%arg0: i32) -> (i32, i32) {
    %c0_i32 = arith.constant 0 : i32
    %c0_i32_0 = arith.constant 0 : i32
    %c0_i32_1 = arith.constant 0 : i32
    return %c0_i32, %c0_i32_0 : i32, i32
  }
  func.func @transform_3(%arg0: i32) -> (i32, i32, i32) {
    %c0_i32 = arith.constant 0 : i32
    %c0_i32_0 = arith.constant 0 : i32
    %c0_i32_1 = arith.constant 0 : i32
    return %arg0, %c0_i32, %c0_i32_0 : i32, i32, i32
  }
  func.func @transform_4(%arg0: i32) -> (i32, i32, i32) {
    %c0_i32 = arith.constant 0 : i32
    %c0_i32_0 = arith.constant 0 : i32
    %c0_i32_1 = arith.constant 0 : i32
    return %arg0, %c0_i32, %c0_i32_0 : i32, i32, i32
  }
  func.func @transform_5(%arg0: i32) -> (i32, i32) {
    %c0_i32 = arith.constant 0 : i32
    %c0_i32_0 = arith.constant 0 : i32
    return %arg0, %c0_i32 : i32, i32
  }
}

module attributes {stable_mosaic.version = 11 : i64} {
  func.func @_head_kernel(%arg0: i32, %arg1: memref<2x2176xf32, #tpu.memory_space<vmem>>, %arg2: memref<2176x256xf32, #tpu.memory_space<vmem>>, %arg3: memref<1x256xf32, #tpu.memory_space<vmem>>, %arg4: memref<128x128xf32, #tpu.memory_space<vmem>>, %arg5: memref<1x128xf32, #tpu.memory_space<vmem>>, %arg6: memref<128x32xf32, #tpu.memory_space<vmem>>, %arg7: memref<1x32xf32, #tpu.memory_space<vmem>>, %arg8: memref<32x5xf32, #tpu.memory_space<vmem>>, %arg9: memref<1x5xf32, #tpu.memory_space<vmem>>, %arg10: memref<2x128xf32, #tpu.memory_space<vmem>>) attributes {dimension_semantics = [#tpu.dimension_semantics<parallel>], iteration_bounds = array<i64: 1>, scalar_prefetch = 0 : i64, scratch_operands = 0 : i64, tpu.core_type = #tpu.core_type<tc>, window_params = [{transform_indices = @transform_0, window_bounds = array<i64: 2, 2176>}, {pipeline_mode = #tpu.pipeline_mode<synchronous>, transform_indices = @transform_1, window_bounds = array<i64: 2176, 256>}, {pipeline_mode = #tpu.pipeline_mode<synchronous>, transform_indices = @transform_2, window_bounds = array<i64: 1, 256>}, {pipeline_mode = #tpu.pipeline_mode<synchronous>, transform_indices = @transform_3, window_bounds = array<i64: 128, 128>}, {pipeline_mode = #tpu.pipeline_mode<synchronous>, transform_indices = @transform_4, window_bounds = array<i64: 1, 128>}, {pipeline_mode = #tpu.pipeline_mode<synchronous>, transform_indices = @transform_5, window_bounds = array<i64: 128, 32>}, {pipeline_mode = #tpu.pipeline_mode<synchronous>, transform_indices = @transform_6, window_bounds = array<i64: 1, 32>}, {pipeline_mode = #tpu.pipeline_mode<synchronous>, transform_indices = @transform_7, window_bounds = array<i64: 32, 5>}, {pipeline_mode = #tpu.pipeline_mode<synchronous>, transform_indices = @transform_8, window_bounds = array<i64: 1, 5>}, {transform_indices = @transform_9, window_bounds = array<i64: 2, 128>}]} {
    %c0 = arith.constant 0 : index
    %c0_0 = arith.constant 0 : index
    %0 = vector.load %arg1[%c0, %c0_0] : memref<2x2176xf32, #tpu.memory_space<vmem>>, vector<2x2176xf32>
    %c0_1 = arith.constant 0 : index
    %c0_2 = arith.constant 0 : index
    %1 = vector.load %arg2[%c0_1, %c0_2] : memref<2176x256xf32, #tpu.memory_space<vmem>>, vector<2176x256xf32>
    %cst = arith.constant dense<0.000000e+00> : vector<2x256xf32>
    %2 = tpu.matmul %0, %1, %cst {dimension_numbers = #tpu.dot_dimension_numbers<[1], [0], [0], [1], [0, 0, 1, 1], [], []>} : vector<2x2176xf32>, vector<2176x256xf32>, vector<2x256xf32> -> vector<2x256xf32>
    %c0_3 = arith.constant 0 : index
    %c0_4 = arith.constant 0 : index
    %3 = vector.load %arg3[%c0_3, %c0_4] : memref<1x256xf32, #tpu.memory_space<vmem>>, vector<1x256xf32>
    %4 = vector.broadcast %3 : vector<1x256xf32> to vector<2x256xf32>
    %5 = arith.addf %2, %4 : vector<2x256xf32>
    %cst_5 = arith.constant 0.000000e+00 : f32
    %6 = vector.broadcast %cst_5 : f32 to vector<2x256xf32>
    %7 = arith.maximumf %5, %6 : vector<2x256xf32>
    %8 = vector.extract_strided_slice %7 {offsets = [0, 0], sizes = [2, 128], strides = [1, 1]} : vector<2x256xf32> to vector<2x128xf32>
    %9 = vector.extract_strided_slice %7 {offsets = [0, 128], sizes = [2, 128], strides = [1, 1]} : vector<2x256xf32> to vector<2x128xf32>
    %10 = arith.maximumf %8, %9 : vector<2x128xf32>
    %c0_6 = arith.constant 0 : index
    %c0_7 = arith.constant 0 : index
    %11 = vector.load %arg4[%c0_6, %c0_7] : memref<128x128xf32, #tpu.memory_space<vmem>>, vector<128x128xf32>
    %cst_8 = arith.constant dense<0.000000e+00> : vector<2x128xf32>
    %12 = tpu.matmul %10, %11, %cst_8 {dimension_numbers = #tpu.dot_dimension_numbers<[1], [0], [0], [1], [0, 0, 1, 1], [], []>} : vector<2x128xf32>, vector<128x128xf32>, vector<2x128xf32> -> vector<2x128xf32>
    %c0_9 = arith.constant 0 : index
    %c0_10 = arith.constant 0 : index
    %13 = vector.load %arg5[%c0_9, %c0_10] : memref<1x128xf32, #tpu.memory_space<vmem>>, vector<1x128xf32>
    %14 = vector.broadcast %13 : vector<1x128xf32> to vector<2x128xf32>
    %15 = arith.addf %12, %14 : vector<2x128xf32>
    %cst_11 = arith.constant 0.000000e+00 : f32
    %16 = vector.broadcast %cst_11 : f32 to vector<2x128xf32>
    %17 = arith.maximumf %15, %16 : vector<2x128xf32>
    %c0_12 = arith.constant 0 : index
    %c0_13 = arith.constant 0 : index
    %18 = vector.load %arg6[%c0_12, %c0_13] : memref<128x32xf32, #tpu.memory_space<vmem>>, vector<128x32xf32>
    %cst_14 = arith.constant dense<0.000000e+00> : vector<2x32xf32>
    %19 = tpu.matmul %17, %18, %cst_14 {dimension_numbers = #tpu.dot_dimension_numbers<[1], [0], [0], [1], [0, 0, 1, 1], [], []>} : vector<2x128xf32>, vector<128x32xf32>, vector<2x32xf32> -> vector<2x32xf32>
    %c0_15 = arith.constant 0 : index
    %c0_16 = arith.constant 0 : index
    %20 = vector.load %arg7[%c0_15, %c0_16] : memref<1x32xf32, #tpu.memory_space<vmem>>, vector<1x32xf32>
    %21 = vector.broadcast %20 : vector<1x32xf32> to vector<2x32xf32>
    %22 = arith.addf %19, %21 : vector<2x32xf32>
    %cst_17 = arith.constant 0.000000e+00 : f32
    %23 = vector.broadcast %cst_17 : f32 to vector<2x32xf32>
    %24 = arith.maximumf %22, %23 : vector<2x32xf32>
    %c0_18 = arith.constant 0 : index
    %c0_19 = arith.constant 0 : index
    %25 = vector.load %arg8[%c0_18, %c0_19] : memref<32x5xf32, #tpu.memory_space<vmem>>, vector<32x5xf32>
    %cst_20 = arith.constant dense<0.000000e+00> : vector<2x5xf32>
    %26 = tpu.matmul %24, %25, %cst_20 {dimension_numbers = #tpu.dot_dimension_numbers<[1], [0], [0], [1], [0, 0, 1, 1], [], []>} : vector<2x32xf32>, vector<32x5xf32>, vector<2x5xf32> -> vector<2x5xf32>
    %c0_21 = arith.constant 0 : index
    %c0_22 = arith.constant 0 : index
    %27 = vector.load %arg9[%c0_21, %c0_22] : memref<1x5xf32, #tpu.memory_space<vmem>>, vector<1x5xf32>
    %28 = vector.broadcast %27 : vector<1x5xf32> to vector<2x5xf32>
    %29 = arith.addf %26, %28 : vector<2x5xf32>
    %cst_23 = arith.constant dense<0xFF800000> : vector<2xf32>
    %30 = vector.multi_reduction <maximumf>, %29, %cst_23 [1] : vector<2x5xf32> to vector<2xf32>
    %31 = vector.shape_cast %30 : vector<2xf32> to vector<2x1xf32>
    %32 = vector.broadcast %31 : vector<2x1xf32> to vector<2x5xf32>
    %33 = arith.subf %29, %32 : vector<2x5xf32>
    %34 = math.exp %33 : vector<2x5xf32>
    %cst_24 = arith.constant dense<0.000000e+00> : vector<2xf32>
    %35 = vector.multi_reduction <add>, %34, %cst_24 [1] : vector<2x5xf32> to vector<2xf32>
    %36 = vector.shape_cast %35 : vector<2xf32> to vector<2x1xf32>
    %37 = math.log %36 : vector<2x1xf32>
    %38 = arith.addf %31, %37 : vector<2x1xf32>
    %39 = vector.broadcast %38 : vector<2x1xf32> to vector<2x5xf32>
    %40 = arith.subf %29, %39 : vector<2x5xf32>
    %cst_25 = arith.constant 0.000000e+00 : f32
    %41 = vector.broadcast %cst_25 : f32 to vector<2x27xf32>
    %cst_26 = arith.constant 0.000000e+00 : f32
    %42 = vector.broadcast %cst_26 : f32 to vector<2x27xf32>
    %cst_27 = arith.constant 0.000000e+00 : f32
    %43 = vector.broadcast %cst_27 : f32 to vector<2x32xf32>
    %44 = tpu.concatenate %40, %41, %29, %42, %24, %43 in 1 : vector<2x5xf32>, vector<2x27xf32>, vector<2x5xf32>, vector<2x27xf32>, vector<2x32xf32>, vector<2x32xf32> -> vector<2x128xf32>
    %c0_28 = arith.constant 0 : index
    %c0_29 = arith.constant 0 : index
    %45 = vector.load %arg10[%c0_28, %c0_29] : memref<2x128xf32, #tpu.memory_space<vmem>>, vector<2x128xf32>
    tpu.vector_store %arg10[%c0_28, %c0_29], %44 {strides = array<i32>} : memref<2x128xf32, #tpu.memory_space<vmem>>, vector<2x128xf32>,
    return
  }
  func.func @transform_0(%arg0: i32) -> (i32, i32) {
    %c0_i32 = arith.constant 0 : i32
    %c0_i32_0 = arith.constant 0 : i32
    return %arg0, %c0_i32 : i32, i32
  }
  func.func @transform_1(%arg0: i32) -> (i32, i32) {
    %c0_i32 = arith.constant 0 : i32
    %c0_i32_0 = arith.constant 0 : i32
    %c0_i32_1 = arith.constant 0 : i32
    return %c0_i32, %c0_i32_0 : i32, i32
  }
  func.func @transform_2(%arg0: i32) -> (i32, i32) {
    %c0_i32 = arith.constant 0 : i32
    %c0_i32_0 = arith.constant 0 : i32
    %c0_i32_1 = arith.constant 0 : i32
    return %c0_i32, %c0_i32_0 : i32, i32
  }
  func.func @transform_3(%arg0: i32) -> (i32, i32) {
    %c0_i32 = arith.constant 0 : i32
    %c0_i32_0 = arith.constant 0 : i32
    %c0_i32_1 = arith.constant 0 : i32
    return %c0_i32, %c0_i32_0 : i32, i32
  }
  func.func @transform_4(%arg0: i32) -> (i32, i32) {
    %c0_i32 = arith.constant 0 : i32
    %c0_i32_0 = arith.constant 0 : i32
    %c0_i32_1 = arith.constant 0 : i32
    return %c0_i32, %c0_i32_0 : i32, i32
  }
  func.func @transform_5(%arg0: i32) -> (i32, i32) {
    %c0_i32 = arith.constant 0 : i32
    %c0_i32_0 = arith.constant 0 : i32
    %c0_i32_1 = arith.constant 0 : i32
    return %c0_i32, %c0_i32_0 : i32, i32
  }
  func.func @transform_6(%arg0: i32) -> (i32, i32) {
    %c0_i32 = arith.constant 0 : i32
    %c0_i32_0 = arith.constant 0 : i32
    %c0_i32_1 = arith.constant 0 : i32
    return %c0_i32, %c0_i32_0 : i32, i32
  }
  func.func @transform_7(%arg0: i32) -> (i32, i32) {
    %c0_i32 = arith.constant 0 : i32
    %c0_i32_0 = arith.constant 0 : i32
    %c0_i32_1 = arith.constant 0 : i32
    return %c0_i32, %c0_i32_0 : i32, i32
  }
  func.func @transform_8(%arg0: i32) -> (i32, i32) {
    %c0_i32 = arith.constant 0 : i32
    %c0_i32_0 = arith.constant 0 : i32
    %c0_i32_1 = arith.constant 0 : i32
    return %c0_i32, %c0_i32_0 : i32, i32
  }
  func.func @transform_9(%arg0: i32) -> (i32, i32) {
    %c0_i32 = arith.constant 0 : i32
    %c0_i32_0 = arith.constant 0 : i32
    return %arg0, %c0_i32 : i32, i32
  }
}

</mosaic_0001>

<bundles_post_ra>
// kernel: _dgcnn_forward.2
= control target key start
LH: loop header
LB: loop body
LE: loop exit
PB: predicated region body
PF: predicated region fallthrough
CT: control target
= control target key end

     0   :  { %10 = vsyncpa [#allocation4], 0  ;;  %s1055_s0 = inlined_call_operand.vmem [shape: bf16[128,128], index: 0, kind: input, shape index: {}]   ;;  %s1056_s1 = inlined_call_operand.vmem [shape: bf16[32,128], index: 1, kind: input, shape index: {}]   ;;  %s1057_s2 = inlined_call_operand.vmem [shape: f32[1,128], index: 2, kind: input, shape index: {}]   ;;  %s1058_s3 = inlined_call_operand.hbm [shape: f32[5,32,32], index: 3, kind: input, shape index: {}]   ;;  %s1059_s4 = inlined_call_operand.vmem [shape: f32[5,32,1], index: 4, kind: input, shape index: {}]   ;;  %s1060_s5 = inlined_call_operand.vmem [shape: f32[160,128], index: 5, kind: output, shape index: {}]  }
   0x1   :  { %12 = vsyncpa [#allocation4 + $0x1], 0  ;;  %s887_s18 = smov 0   ;;  %s889_s19 = smov 0  }
   0x2   :  { %s891_s20 = smov 0   ;;  %s893_s21 = smov 0  }
   0x3 LB: > { %s906_s22 = sadd.s32 4294967295, %s851_s21   ;;  %s909_s23 = sadd.s32 1, %s851_s21   ;;  %s851_s21 = sphi %s893_s21, %s1067_s21   ;;  %s847_s20 = sphi %s891_s20, %s1066_s20   ;;  %s843_s19 = sphi %s889_s19, %s1065_s19   ;;  %s839_s18 = sphi %s887_s18, %s1064_s18  }
   0x4   : > { %s85_s24 = ssub.s32 %s851_s21, %s909_s23  ;;  %s88_s25 = sadd.s32 1, %s847_s20 }
   0x5   : > { %p86_p0 = scmp.eq.s32.totalorder %s85_s24, 0  ;;  %p95_p1 = scmp.ne.s32.totalorder %s847_s20, %s843_s19 }
   0x6   : > { %p96_p2 = scmp.eq.s32.totalorder %s851_s21, 0  ;;  %p101_p3 = scmp.ne.s32.totalorder %s843_s19, %s839_s18 }
   0x7   : > { %s919_s26 = scalar_select %p86_p0, %s847_s20, %s88_s25  }
   0x8   : > { %p97_p4 = por %p96_p2, %p95_p1  ;;  %p102_p5 = scmp.eq.s32.totalorder %s906_s22, 0 }
   0x9   : > { %p731_p6 = scmp.lt.s32.totalorder %s851_s21, 5  ;;  %s186_s28 = sand.u32 1, %s847_s20  }
   0xa   : > { %p923_p7 = por %p102_p5, %p101_p3  ;;  %s636_s29 = sshll.u32 %s186_s28, 5 }
   0xb   : > { %s663_s30 = sshll.u32 %s851_s21, 9  ;;  %s190_s9 = scalar_lea.vmem [#allocation3], %s636_s29 }
   0xc   : > { %s932_s8 = scalar_lea.hbm %s1058_s3, %s663_s30  ;;  %s197_s10 = sshll.u32 %s190_s9, 4  ;;  %s934_s10 = int_to_ptr.vmem [resolvable:$true] %s197_s10 }
   0xd   : > { %p936_p8 = pnand %p731_p6, %p97_p4  ;;  %s941_s12 = scalar_lea.sflag [#allocation4], %s186_s28 }
   0xe   : > { %s787_s13 = scalar_lea.hbm %s932_s8, 512  ;;  %s792_s16 = scalar_lea.hbm %s1058_s3, 2560 }
   0xf   : > { %p788_p10 = scmp.ne.s32.totalorder %s932_s8, %s787_s13  ;;  %p789_p11 = pneg %p936_p8 }
  0x10   : > { %p793_p0 = scmp.lt.u32.totalorder %s932_s8, %s1058_s3  ;;  %p794_p1 = scmp.lt.u32.totalorder %s792_s16, %s787_s13 }
  0x11   : > { %p790_p12 = pnand %p789_p11, %p788_p10  ;;  %p796_p3 = scmp.lt.u32.totalorder %s787_s13, %s932_s8 }
  0x12   : > { %p795_p2 = por %p794_p1, %p793_p0 }
  0x13   : > { %p791_p13 = pneg %p790_p12 }
  0x14   : > { %p797_p4 = por %p796_p3, %p795_p2 }
  0x16   : > { %p798_p5 = pnand %p797_p4, %p791_p13 }
  0x18   : > { %801 = shalt.err (!%p798_p5)
}
  0x19   : > { %s802_s24 = scalar_lea.vmem %s934_s10, 512  ;;  %s853_s25 = smov [#allocation3]  }
  0x1a   : > { %p803_p6 = scmp.ne.s32.totalorder %s934_s10, %s802_s24  ;;  %s807_s28 = sshll.u32 %s853_s25, 4  ;;  %s808_s28 = int_to_ptr.vmem [resolvable:$false] %s807_s28 }
  0x1b   : > { %s809_s29 = scalar_lea.vmem %s808_s28, 1024  ;;  %p810_p9 = scmp.lt.s32.totalorder %s934_s10, %s808_s28 }
  0x1c   : > { %p805_p10 = pnand %p803_p6, %p789_p11  ;;  %p811_p0 = scmp.lt.s32.totalorder %s809_s29, %s802_s24 }
  0x1e   : > { %p806_p12 = pneg %p805_p10  ;;  %p812_p1 = por %p811_p0, %p810_p9 }
  0x20   : > { %p813_p2 = pnand %p812_p1, %p806_p12 }
  0x22   : > { %816 = shalt.err (!%p813_p2)
}
  0x23   : > { %s854_s30 = smov 128   ;;  %s855_s6 = smov 8  }
  0x24   : > { %730 = dma.hbm_to_vmem [thread:$0]  (!%p936_p8), %s932_s8, 512, %s934_s10, %s941_s12, %s854_s30, %s854_s30, %s855_s6  }
  0x25   : > { %p213_p11 = scmp.lt.s32.totalorder %s851_s21, 6  ;;  %p1063_p13 = scmp.ge.s32.totalorder %s851_s21, 1 }
  0x27   : > { %p214_p3 = pnand %p1063_p13, %p213_p11 }
  0x28   : > { %s219_s7 = sand.u32 (!%p214_p3), 1, %s843_s19  }
  0x29   : > { %217 = sbr.rel (%p214_p3) target bundleno = 550 (0x226), region = 40  ;;  %s640_s9 = sshll.u32 (!%p214_p3), %s219_s7, 5 }
  0x2a   : > { %s220_s13 = scalar_lea.sflag (!%p214_p3), [#allocation4], %s219_s7  ;;  %s973_s14 = scalar_lea.vmem (!%p214_p3), [#allocation3], %s640_s9 }
  0x30   : > { %834 = dma.done.wait (%p923_p7), %s220_s13, 512  }
  0x31   : > { %836 = vsyncadd (%p923_p7), %s220_s13, 4294966784  ;;  %p255_p8 = scmp.lt.s32.totalorder %s906_s22, 4  ;;  %s643_s8 = sshll.u32 %s906_s22, 2 }
  0x32   : > { %p261_p9 = scmp.lt.s32.totalorder %s643_s8, 19  ;;  %p645_p7 = scmp.ne.s32.totalorder %s906_s22, 0 }
  0x33   : > { %s256_s21 = scalar_select %p255_p8, %s906_s22, 4 }
  0x34   : > { %s1069_s8 = smov (!%p261_p9, %s643_s8), 19  ;;  %270 = sbr.rel (%p645_p7) target bundleno = 59 (0x3b), region = 48 }
  0x35   : > { %s664_s10 = sshll.u32 %s256_s21, 5  ;;  %s644_s16 = sshll.u32 %s1069_s8, 3  ;;  %v767_v0 = vld [vmem:[%s1056_s1] sm:$0xff] (!%p645_p7)   ;;  %v768_v1 = vld [vmem:[%s1056_s1 + $0x8] sm:$0xff] (!%p645_p7)  }
  0x36   : > { %s985_s15 = scalar_lea.vmem %s1059_s4, %s664_s10  ;;  %s990_s27 = scalar_lea.vmem %s1060_s5, %s644_s16  ;;  %287 = vst [vmem:[#allocation2] sm:$0xff] (!%p645_p7), %v767_v0  ;;  %288 = vst [vmem:[#allocation2 + $0x8] sm:$0xff] (!%p645_p7), %v768_v1 }
  0x3b PF: > { %v771_v2 = vld [vmem:[%s1055_s0] sm:$0xff]   ;;  %v772_v3 = vld [vmem:[%s1055_s0 + $0x8] sm:$0xff]   ;;  %v773_v4 = vld [vmem:[%s1055_s0 + $0x10] sm:$0xff]   ;;  %vm443_vm0 = vcmask 261120   ;;  %v856_v15 = vmov 0  }
  0x3c   : > { %683 = vmatprep.subr.bf16.mxu0 %v771_v2  ;;  %v774_v5 = vld [vmem:[%s1055_s0 + $0x18] sm:$0xff]   ;;  %v775_v7 = vld [vmem:[%s1055_s0 + $0x20] sm:$0xff]   ;;  %v776_v8 = vld [vmem:[%s1055_s0 + $0x28] sm:$0xff]   ;;  %769 = vset.pattern.permute.xlu0 %v856_v15 }
  0x3d   : > { %684 = vmatpush3.bf16.msra.mxu0 %v771_v2  ;;  %v289_v6 = vld [vmem:[#allocation2] sm:$0xff]  ;;  %v777_v9 = vld [vmem:[%s1055_s0 + $0x30] sm:$0xff]   ;;  %v778_v10 = vld [vmem:[%s1055_s0 + $0x38] sm:$0xff]   ;;  %770 = vset.pattern.permute.xlu1 %v856_v15 }
  0x3e   : > { %685 = vmatprep.subr.bf16.mxu0 %v772_v3  ;;  %699 = vmatprep.mubr.bf16.mxu0 %v289_v6  ;;  %v290_v11 = vld [vmem:[#allocation2 + $0x8] sm:$0xff]  ;;  %v404_v12 = vld [vmem:[%s973_s14] sm:$0xff]  ;;  %v408_v13 = vld [vmem:[%s985_s15] sm:$0xff] }
  0x3f   : > { %711 = vmatprep.mubr.msk.f32.mxu1 %vm443_vm0, %v404_v12  ;;  %v410_v14 = vld [vmem:[%s985_s15 + $0x10] sm:$0xff]  ;;  %415 = vperm.xlu0 %769, %v408_v13   ;;  %v409_v16 = vld [vmem:[%s985_s15 + $0x8] sm:$0xff]  ;;  %v411_v17 = vld [vmem:[%s985_s15 + $0x18] sm:$0xff] }
  0x40   : > { %425 = vperm.xlu1 %770, %v410_v14   ;;  %v405_v24 = vld [vmem:[%s973_s14 + $0x8] sm:$0xff]  ;;  %v406_v25 = vld [vmem:[%s973_s14 + $0x10] sm:$0xff]  ;;  %v407_v26 = vld [vmem:[%s973_s14 + $0x18] sm:$0xff] }
  0x41   : > { %686 = vmatpush3.bf16.msra.mxu0 %v772_v3  ;;  %v656_v28 = vld [vmem:[%s1057_s2] ss:$0 sm:$0xff] }
  0x42   : > { %687 = vmatprep.subr.bf16.mxu0 %v773_v4 }
  0x43   : > { %420 = vperm.xlu0 %769, %v409_v16  }
  0x44   : > { %430 = vperm.xlu1 %770, %v411_v17  }
  0x45   : > { %688 = vmatpush3.bf16.msra.mxu0 %v773_v4 }
  0x46   : > { %689 = vmatprep.subr.bf16.mxu0 %v774_v5 }
  0x49   : > { %690 = vmatpush3.bf16.msra.mxu0 %v774_v5 }
  0x4a   : > { %691 = vmatprep.subr.bf16.mxu0 %v775_v7 }
  0x4d   : > { %692 = vmatpush3.bf16.msra.mxu0 %v775_v7 }
  0x4e   : > { %693 = vmatprep.subr.bf16.mxu0 %v776_v8 }
  0x51   : > { %694 = vmatpush3.bf16.msra.mxu0 %v776_v8 }
  0x52   : > { %695 = vmatprep.subr.bf16.mxu0 %v777_v9 }
  0x55   : > { %696 = vmatpush3.bf16.msra.mxu0 %v777_v9 }
  0x56   : > { %697 = vmatprep.subr.bf16.mxu0 %v778_v10 }
  0x59   : > { %698 = vmatpush3.bf16.msra.mxu0 %v778_v10 }
  0x5c   : > { %700 = vmatmul.mubr.bf16.vlgmr.msra.gmra.mrb[0].mxu0 %v290_v11 }
  0xbe   : > { %v416_v27 = vpop.permute.xlu0 %415 }
  0xbf   : > { %v426_v29 = vpop.permute.xlu1 %425  ;;  %v439_v32 = vmul.f32 %v656_v28, %v416_v27 }
  0xc0   : > { %v441_v39 = vmul.f32 %v656_v28, %v426_v29 }
  0xc2   : > { %v421_v30 = vpop.permute.xlu0 %420 }
  0xc3   : > { %v440_v31 = vmul.f32 %v656_v28, %v421_v30  ;;  %v431_v33 = vpop.permute.xlu1 %430 }
  0xc4   : > { %v442_v38 = vmul.f32 %v656_v28, %v431_v33 }
 0x12f   : > { %v701_v18 = vpop.f32.mrb[0].mxu0 }
 0x130   : > { %v389_v19 = vpop.f32.mrb[1].mxu0 }
 0x131   : > { %v702_v20 = vpop.f32.mrb[2].mxu0 }
 0x132   : > { %v721_v21 = vpack.c.bf16 %v702_v20, %v701_v18  ;;  %v392_v22 = vpop.f32.mrb[3].mxu0 }
 0x133   : > { %v717_v23 = vpack.c.bf16 %v392_v22, %v389_v19 }
 0x135   : > { %718 = vmatprep.subr.bf16.mxu1 %v717_v23 }
 0x136   : > { %720 = vmatpush3.bf16.msra.mxu1 %v717_v23 }
 0x137   : > { %722 = vmatprep.subr.bf16.mxu1 %v721_v21 }
 0x13a   : > { %724 = vmatpush3.bf16.msra.mxu1 %v721_v21 }
 0x13d   : > { %712 = vmatmul.mubr.msk.f32.vlgmr.msra.gmra.mrb[0].mxu1 %vm443_vm0, %v405_v24 }
 0x13e   : > { %714 = vmatprep.mubr.msk.f32.mxu1 %vm443_vm0, %v406_v25 }
 0x141   : > { %715 = vmatmul.mubr.msk.f32.gmra.mrb[2].mxu1 %vm443_vm0, %v407_v26 }
 0x210   : > { %v713_v34 = vpop.f32.mrb[0].mxu1 }
 0x211   : > { %v528_v35 = vadd.f32 %v713_v34, %v440_v31  ;;  %v522_v36 = vpop.f32.mrb[1].mxu1 }
 0x212   : > { %v523_v37 = vadd.f32 %v522_v36, %v439_v32 }
 0x213   : > { %779 = vtanh.f32 %v528_v35 }
 0x214   : > { %781 = vtanh.f32 %v523_v37  ;;  %v716_v40 = vpop.f32.mrb[2].mxu1 }
 0x215   : > { %v538_v41 = vadd.f32 %v716_v40, %v442_v38  ;;  %v532_v42 = vpop.f32.mrb[3].mxu1 }
 0x216   : > { %v533_v43 = vadd.f32 %v532_v42, %v441_v39 }
 0x217   : > { %783 = vtanh.f32 %v538_v41 }
 0x218   : > { %785 = vtanh.f32 %v533_v43 }
 0x21d   : > { %v780_v44 = vpop.eup %779 }
 0x21e   : > { %v782_v45 = vpop.eup %781  ;;  %546 = vst [vmem:[%s990_s27 + $0x8] sm:$0xff] %v780_v44 }
 0x21f   : > { %545 = vst [vmem:[%s990_s27] sm:$0xff] %v782_v45  ;;  %v549_v46 = vpack.c.bf16 %v780_v44, %v782_v45 }
 0x221   : > { %v784_v47 = vpop.eup %783  ;;  %551 = vst [vmem:[#allocation2] sm:$0xff] %v549_v46 }
 0x222   : > { %v786_v48 = vpop.eup %785  ;;  %548 = vst [vmem:[%s990_s27 + $0x18] sm:$0xff] %v784_v47 }
 0x223   : > { %547 = vst [vmem:[%s990_s27 + $0x10] sm:$0xff] %v786_v48  ;;  %v550_v49 = vpack.c.bf16 %v784_v47, %v786_v48 }
 0x225   : > { %552 = vst [vmem:[#allocation2 + $0x8] sm:$0xff] %v550_v49 }
 0x226 PF: > { %p15_p4 = scmp.ge.s32.totalorder %s909_s23, 7   ;;  %s1064_s18 = smov %s843_s19 }
 0x227   : > { %s1065_s19 = smov %s847_s20  ;;  %s1066_s20 = smov %s919_s26 }
 0x228   : > { %s1067_s21 = smov %s909_s23  ;;  %17 = sbr.rel (!%p15_p4) target bundleno = 3 (0x3), region = 87 }
 0x22f   :  { %575 = vsyncpa [#allocation4], 1 }
 0x230   :  { %577 = vsyncpa [#allocation4 + $0x1], 1 }

// kernel: _dgcnn_forward.3
= control target key start
LH: loop header
LB: loop body
LE: loop exit
PB: predicated region body
PF: predicated region fallthrough
CT: control target
= control target key end

     0   :  { %vm2398_vm0 = vmmov 0   ;;  %vm1531_vm1 = vcmask 261120   ;;  %vm1605_vm2 = vcmask 33792   ;;  %vm1626_vm3 = vcmask 39936   ;;  %s4323_s1 = inlined_call_operand.vmem [shape: f32[2176,256], index: 1, kind: input, shape index: {}]   ;;  %s4324_s0 = inlined_call_operand.vmem [shape: f32[2,2176], index: 0, kind: input, shape index: {}]   ;;  %s4325_s3 = inlined_call_operand.vmem [shape: f32[128,128], index: 3, kind: input, shape index: {}]   ;;  %s4326_s2 = inlined_call_operand.vmem [shape: f32[1,256], index: 2, kind: input, shape index: {}]   ;;  %s4327_s5 = inlined_call_operand.vmem [shape: f32[128,32], index: 5, kind: input, shape index: {}]   ;;  %s4328_s4 = inlined_call_operand.vmem [shape: f32[1,128], index: 4, kind: input, shape index: {}]   ;;  %s4329_s7 = inlined_call_operand.vmem [shape: f32[32,5], index: 7, kind: input, shape index: {}]   ;;  %s4330_s6 = inlined_call_operand.vmem [shape: f32[1,32], index: 6, kind: input, shape index: {}]   ;;  %s4331_s8 = inlined_call_operand.vmem [shape: f32[1,5], index: 8, kind: input, shape index: {}]   ;;  %s4332_s9 = inlined_call_operand.vmem [shape: f32[2,128], index: 9, kind: output, shape index: {}]  }
   0x1   :  { %v38_v0 = vld [vmem:[%s4323_s1 + $0x8] sm:$0xff]  ;;  %v40_v1 = vld [vmem:[%s4323_s1 + $0x18] sm:$0xff]  ;;  %v37_v5 = vld [vmem:[%s4323_s1] sm:$0xff]  ;;  %vm1629_vm4 = vcmask 302080   ;;  %vm1631_vm5 = vcmask 523264   ;;  %vm1633_vm6 = vcmask 785408  }
   0x2   :  { %v230_v2 = vld [vmem:[%s4323_s1 + $0x608] sm:$0xff]  ;;  %v1765_v3 = vpack.c.bf16 %v40_v1, %v38_v0  ;;  %v232_v4 = vld [vmem:[%s4323_s1 + $0x618] sm:$0xff]  ;;  %v39_v6 = vld [vmem:[%s4323_s1 + $0x10] sm:$0xff] }
   0x3   :  { %v1957_v7 = vpack.c.bf16 %v232_v4, %v230_v2  ;;  %v1767_v8 = vpack.c.bf16 %v39_v6, %v37_v5  ;;  %v229_v9 = vld [vmem:[%s4323_s1 + $0x600] sm:$0xff]  ;;  %v231_v10 = vld [vmem:[%s4323_s1 + $0x610] sm:$0xff]  ;;  %v42_v11 = vld [vmem:[%s4323_s1 + $0x28] sm:$0xff] }
   0x4   :  { %1766 = vmatprep.subr.bf16.mxu1 %v1765_v3  ;;  %v1959_v12 = vpack.c.bf16 %v231_v10, %v229_v9  ;;  %v44_v13 = vld [vmem:[%s4323_s1 + $0x38] sm:$0xff]  ;;  %v234_v14 = vld [vmem:[%s4323_s1 + $0x628] sm:$0xff]  ;;  %v41_v18 = vld [vmem:[%s4323_s1 + $0x20] sm:$0xff] }
   0x5   :  { %v236_v15 = vld [vmem:[%s4323_s1 + $0x638] sm:$0xff]  ;;  %1958 = vmatprep.subr.bf16.mxu0 %v1957_v7  ;;  %1768 = vmatpush1.bf16.msra.mxu1 %v1767_v8  ;;  %v1769_v16 = vpack.c.bf16 %v44_v13, %v42_v11  ;;  %v43_v19 = vld [vmem:[%s4323_s1 + $0x30] sm:$0xff]  ;;  %v233_v20 = vld [vmem:[%s4323_s1 + $0x620] sm:$0xff] }
   0x6   :  { %v1961_v17 = vpack.c.bf16 %v236_v15, %v234_v14  ;;  %1960 = vmatpush1.bf16.msra.mxu0 %v1959_v12  ;;  %v1771_v21 = vpack.c.bf16 %v43_v19, %v41_v18  ;;  %v235_v22 = vld [vmem:[%s4323_s1 + $0x630] sm:$0xff]  ;;  %v46_v23 = vld [vmem:[%s4323_s1 + $0x48] sm:$0xff]  ;;  %v48_v24 = vld [vmem:[%s4323_s1 + $0x58] sm:$0xff] }
   0x7   :  { %1770 = vmatprep.subr.bf16.mxu1 %v1769_v16  ;;  %v1963_v25 = vpack.c.bf16 %v235_v22, %v233_v20  ;;  %v1773_v26 = vpack.c.bf16 %v48_v24, %v46_v23  ;;  %v238_v27 = vld [vmem:[%s4323_s1 + $0x648] sm:$0xff]  ;;  %v240_v28 = vld [vmem:[%s4323_s1 + $0x658] sm:$0xff]  ;;  %v45_v29 = vld [vmem:[%s4323_s1 + $0x40] sm:$0xff] }
   0x8   :  { %1962 = vmatprep.subr.bf16.mxu0 %v1961_v17  ;;  %v1965_v30 = vpack.c.bf16 %v240_v28, %v238_v27  ;;  %v47_v31 = vld [vmem:[%s4323_s1 + $0x50] sm:$0xff]  ;;  %v237_v32 = vld [vmem:[%s4323_s1 + $0x640] sm:$0xff]  ;;  %v50_v35 = vld [vmem:[%s4323_s1 + $0x68] sm:$0xff] }
   0x9   :  { %v239_v33 = vld [vmem:[%s4323_s1 + $0x650] sm:$0xff]  ;;  %1772 = vmatpush1.bf16.msra.mxu1 %v1771_v21  ;;  %v1775_v34 = vpack.c.bf16 %v47_v31, %v45_v29  ;;  %v52_v36 = vld [vmem:[%s4323_s1 + $0x78] sm:$0xff]  ;;  %v242_v37 = vld [vmem:[%s4323_s1 + $0x668] sm:$0xff] }
   0xa   :  { %1964 = vmatpush1.bf16.msra.mxu0 %v1963_v25  ;;  %1774 = vmatprep.subr.bf16.mxu1 %v1773_v26  ;;  %v1967_v38 = vpack.c.bf16 %v239_v33, %v237_v32  ;;  %v1777_v39 = vpack.c.bf16 %v52_v36, %v50_v35  ;;  %v244_v40 = vld [vmem:[%s4323_s1 + $0x678] sm:$0xff]  ;;  %v49_v41 = vld [vmem:[%s4323_s1 + $0x60] sm:$0xff]  ;;  %v51_v42 = vld [vmem:[%s4323_s1 + $0x70] sm:$0xff] }
   0xb   :  { %1966 = vmatprep.subr.bf16.mxu0 %v1965_v30  ;;  %v1969_v43 = vpack.c.bf16 %v244_v40, %v242_v37  ;;  %v241_v44 = vld [vmem:[%s4323_s1 + $0x660] sm:$0xff]  ;;  %v243_v45 = vld [vmem:[%s4323_s1 + $0x670] sm:$0xff]  ;;  %v54_v46 = vld [vmem:[%s4323_s1 + $0x88] sm:$0xff]  ;;  %v1779_v50 = vpack.c.bf16 %v51_v42, %v49_v41 }
   0xc   :  { %v56_v47 = vld [vmem:[%s4323_s1 + $0x98] sm:$0xff]  ;;  %v246_v48 = vld [vmem:[%s4323_s1 + $0x688] sm:$0xff]  ;;  %v1971_v51 = vpack.c.bf16 %v243_v45, %v241_v44  ;;  %v53_v53 = vld [vmem:[%s4323_s1 + $0x80] sm:$0xff] }
   0xd   :  { %v248_v49 = vld [vmem:[%s4323_s1 + $0x698] sm:$0xff]  ;;  %1776 = vmatpush1.bf16.msra.mxu1 %v1775_v34  ;;  %v1781_v52 = vpack.c.bf16 %v56_v47, %v54_v46  ;;  %v55_v54 = vld [vmem:[%s4323_s1 + $0x90] sm:$0xff]  ;;  %v245_v55 = vld [vmem:[%s4323_s1 + $0x680] sm:$0xff]  ;;  %v583_v46 = vlaneseq  ;;  %v2395_v47 = vmov 1983009808  }
   0xe   :  { %1968 = vmatpush1.bf16.msra.mxu0 %v1967_v38  ;;  %1778 = vmatprep.subr.bf16.mxu1 %v1777_v39  ;;  %v1973_v56 = vpack.c.bf16 %v248_v49, %v246_v48  ;;  %v247_v57 = vld [vmem:[%s4323_s1 + $0x690] sm:$0xff]  ;;  %v58_v58 = vld [vmem:[%s4323_s1 + $0xa8] sm:$0xff]  ;;  %v60_v59 = vld [vmem:[%s4323_s1 + $0xb8] sm:$0xff]  ;;  %v1783_v62 = vpack.c.bf16 %v55_v54, %v53_v53  ;;  %v600_v48 = vunpack.c.l.s4 %v2395_v47 }
   0xf   :  { %1970 = vmatprep.subr.bf16.mxu0 %v1969_v43  ;;  %v250_v60 = vld [vmem:[%s4323_s1 + $0x6a8] sm:$0xff]  ;;  %v252_v61 = vld [vmem:[%s4323_s1 + $0x6b8] sm:$0xff]  ;;  %v1975_v63 = vpack.c.bf16 %v247_v57, %v245_v55  ;;  %v1785_v0 = vpack.c.bf16 %v60_v59, %v58_v58  ;;  %v57_v1 = vld [vmem:[%s4323_s1 + $0xa0] sm:$0xff] }
  0x10   :  { %v59_v2 = vld [vmem:[%s4323_s1 + $0xb0] sm:$0xff]  ;;  %v249_v3 = vld [vmem:[%s4323_s1 + $0x6a0] sm:$0xff]  ;;  %v1977_v4 = vpack.c.bf16 %v252_v61, %v250_v60  ;;  %v62_v6 = vld [vmem:[%s4323_s1 + $0xc8] sm:$0xff]  ;;  %v2703_v61 = vshrl.u32 %v583_v46, 7 }
  0x11   :  { %1780 = vmatpush1.bf16.msra.mxu1 %v1779_v50  ;;  %v251_v5 = vld [vmem:[%s4323_s1 + $0x6b0] sm:$0xff]  ;;  %v64_v7 = vld [vmem:[%s4323_s1 + $0xd8] sm:$0xff]  ;;  %v254_v8 = vld [vmem:[%s4323_s1 + $0x6c8] sm:$0xff]  ;;  %v1787_v10 = vpack.c.bf16 %v59_v2, %v57_v1 }
  0x12   :  { %1972 = vmatpush1.bf16.msra.mxu0 %v1971_v51  ;;  %1782 = vmatprep.subr.bf16.mxu1 %v1781_v52  ;;  %v256_v9 = vld [vmem:[%s4323_s1 + $0x6d8] sm:$0xff]  ;;  %v1979_v11 = vpack.c.bf16 %v251_v5, %v249_v3  ;;  %v1789_v12 = vpack.c.bf16 %v64_v7, %v62_v6  ;;  %v61_v13 = vld [vmem:[%s4323_s1 + $0xc0] sm:$0xff]  ;;  %v63_v14 = vld [vmem:[%s4323_s1 + $0xd0] sm:$0xff] }
  0x13   :  { %1974 = vmatprep.subr.bf16.mxu0 %v1973_v56  ;;  %v253_v15 = vld [vmem:[%s4323_s1 + $0x6c0] sm:$0xff]  ;;  %v1981_v16 = vpack.c.bf16 %v256_v9, %v254_v8  ;;  %v255_v17 = vld [vmem:[%s4323_s1 + $0x6d0] sm:$0xff]  ;;  %v66_v18 = vld [vmem:[%s4323_s1 + $0xe8] sm:$0xff]  ;;  %v1791_v22 = vpack.c.bf16 %v63_v14, %v61_v13 }
  0x14   :  { %v68_v19 = vld [vmem:[%s4323_s1 + $0xf8] sm:$0xff]  ;;  %v258_v20 = vld [vmem:[%s4323_s1 + $0x6e8] sm:$0xff]  ;;  %v1983_v23 = vpack.c.bf16 %v255_v17, %v253_v15  ;;  %v65_v25 = vld [vmem:[%s4323_s1 + $0xe0] sm:$0xff] }
  0x15   :  { %1784 = vmatpush1.bf16.msra.mxu1 %v1783_v62  ;;  %v260_v21 = vld [vmem:[%s4323_s1 + $0x6f8] sm:$0xff]  ;;  %v1793_v24 = vpack.c.bf16 %v68_v19, %v66_v18  ;;  %v67_v26 = vld [vmem:[%s4323_s1 + $0xf0] sm:$0xff]  ;;  %v257_v27 = vld [vmem:[%s4323_s1 + $0x6e0] sm:$0xff]  ;;  %v601_v62 = vunpack.c.0.s8 %v600_v48 }
  0x16   :  { %1976 = vmatpush1.bf16.msra.mxu0 %v1975_v63  ;;  %1786 = vmatprep.subr.bf16.mxu1 %v1785_v0  ;;  %v1985_v28 = vpack.c.bf16 %v260_v21, %v258_v20  ;;  %v259_v29 = vld [vmem:[%s4323_s1 + $0x6f0] sm:$0xff]  ;;  %v70_v30 = vld [vmem:[%s4323_s1 + $0x108] sm:$0xff]  ;;  %v72_v31 = vld [vmem:[%s4323_s1 + $0x118] sm:$0xff]  ;;  %v1795_v34 = vpack.c.bf16 %v67_v26, %v65_v25 }
  0x17   :  { %1978 = vmatprep.subr.bf16.mxu0 %v1977_v4  ;;  %v262_v32 = vld [vmem:[%s4323_s1 + $0x708] sm:$0xff]  ;;  %v264_v33 = vld [vmem:[%s4323_s1 + $0x718] sm:$0xff]  ;;  %v1987_v35 = vpack.c.bf16 %v259_v29, %v257_v27  ;;  %v1797_v36 = vpack.c.bf16 %v72_v31, %v70_v30  ;;  %v69_v37 = vld [vmem:[%s4323_s1 + $0x100] sm:$0xff] }
  0x18   :  { %v71_v38 = vld [vmem:[%s4323_s1 + $0x110] sm:$0xff]  ;;  %v261_v39 = vld [vmem:[%s4323_s1 + $0x700] sm:$0xff]  ;;  %v1989_v40 = vpack.c.bf16 %v264_v33, %v262_v32  ;;  %v74_v42 = vld [vmem:[%s4323_s1 + $0x128] sm:$0xff] }
  0x19   :  { %1788 = vmatpush1.bf16.msra.mxu1 %v1787_v10  ;;  %v263_v41 = vld [vmem:[%s4323_s1 + $0x710] sm:$0xff]  ;;  %v76_v43 = vld [vmem:[%s4323_s1 + $0x138] sm:$0xff]  ;;  %v266_v44 = vld [vmem:[%s4323_s1 + $0x728] sm:$0xff]  ;;  %v1799_v49 = vpack.c.bf16 %v71_v38, %v69_v37 }
  0x1a   :  { %1980 = vmatpush1.bf16.msra.mxu0 %v1979_v11  ;;  %1790 = vmatprep.subr.bf16.mxu1 %v1789_v12  ;;  %v268_v45 = vld [vmem:[%s4323_s1 + $0x738] sm:$0xff]  ;;  %v1991_v50 = vpack.c.bf16 %v263_v41, %v261_v39  ;;  %v1801_v51 = vpack.c.bf16 %v76_v43, %v74_v42  ;;  %v73_v52 = vld [vmem:[%s4323_s1 + $0x120] sm:$0xff]  ;;  %v75_v53 = vld [vmem:[%s4323_s1 + $0x130] sm:$0xff]  ;;  %v2730_v11 = vsub.s32 %v601_v62, %v2703_v61 }
  0x1b   :  { %1982 = vmatprep.subr.bf16.mxu0 %v1981_v16  ;;  %v265_v54 = vld [vmem:[%s4323_s1 + $0x720] sm:$0xff]  ;;  %v1993_v55 = vpack.c.bf16 %v268_v45, %v266_v44  ;;  %v267_v56 = vld [vmem:[%s4323_s1 + $0x730] sm:$0xff]  ;;  %v78_v57 = vld [vmem:[%s4323_s1 + $0x148] sm:$0xff]  ;;  %v1803_v63 = vpack.c.bf16 %v75_v53, %v73_v52 }
  0x1c   :  { %v80_v58 = vld [vmem:[%s4323_s1 + $0x158] sm:$0xff]  ;;  %v270_v59 = vld [vmem:[%s4323_s1 + $0x748] sm:$0xff]  ;;  %v1995_v0 = vpack.c.bf16 %v267_v56, %v265_v54  ;;  %v77_v2 = vld [vmem:[%s4323_s1 + $0x140] sm:$0xff] }
  0x1d   :  { %1792 = vmatpush1.bf16.msra.mxu1 %v1791_v22  ;;  %v272_v60 = vld [vmem:[%s4323_s1 + $0x758] sm:$0xff]  ;;  %v1805_v1 = vpack.c.bf16 %v80_v58, %v78_v57  ;;  %v79_v3 = vld [vmem:[%s4323_s1 + $0x150] sm:$0xff]  ;;  %v269_v4 = vld [vmem:[%s4323_s1 + $0x740] sm:$0xff] }
  0x1e   :  { %1984 = vmatpush1.bf16.msra.mxu0 %v1983_v23  ;;  %1794 = vmatprep.subr.bf16.mxu1 %v1793_v24  ;;  %v1997_v5 = vpack.c.bf16 %v272_v60, %v270_v59  ;;  %v271_v6 = vld [vmem:[%s4323_s1 + $0x750] sm:$0xff]  ;;  %v82_v7 = vld [vmem:[%s4323_s1 + $0x168] sm:$0xff]  ;;  %v84_v8 = vld [vmem:[%s4323_s1 + $0x178] sm:$0xff]  ;;  %v1807_v12 = vpack.c.bf16 %v79_v3, %v77_v2 }
  0x1f   :  { %1986 = vmatprep.subr.bf16.mxu0 %v1985_v28  ;;  %v274_v9 = vld [vmem:[%s4323_s1 + $0x768] sm:$0xff]  ;;  %v276_v10 = vld [vmem:[%s4323_s1 + $0x778] sm:$0xff]  ;;  %v81_v13 = vld [vmem:[%s4323_s1 + $0x160] sm:$0xff]  ;;  %v1999_v14 = vpack.c.bf16 %v271_v6, %v269_v4  ;;  %v1809_v15 = vpack.c.bf16 %v84_v8, %v82_v7 }
  0x20   :  { %v83_v16 = vld [vmem:[%s4323_s1 + $0x170] sm:$0xff]  ;;  %v273_v17 = vld [vmem:[%s4323_s1 + $0x760] sm:$0xff]  ;;  %v2001_v19 = vpack.c.bf16 %v276_v10, %v274_v9  ;;  %v86_v20 = vld [vmem:[%s4323_s1 + $0x188] sm:$0xff] }
  0x21   :  { %1796 = vmatpush1.bf16.msra.mxu1 %v1795_v34  ;;  %v275_v18 = vld [vmem:[%s4323_s1 + $0x770] sm:$0xff]  ;;  %v88_v21 = vld [vmem:[%s4323_s1 + $0x198] sm:$0xff]  ;;  %v2753_v22 = vld [vmem:[%s4324_s0] sm:$0xff]  ;;  %v1811_v27 = vpack.c.bf16 %v83_v16, %v81_v13 }
  0x22   :  { %1988 = vmatpush1.bf16.msra.mxu0 %v1987_v35  ;;  %1798 = vmatprep.subr.bf16.mxu1 %v1797_v36  ;;  %v278_v23 = vld [vmem:[%s4323_s1 + $0x788] sm:$0xff]  ;;  %v280_v24 = vld [vmem:[%s4323_s1 + $0x798] sm:$0xff]  ;;  %v2763_v25 = vrot.slane %v2753_v22, %v2730_v11  ;;  %v2003_v29 = vpack.c.bf16 %v275_v18, %v273_v17  ;;  %v1813_v30 = vpack.c.bf16 %v88_v21, %v86_v20  ;;  %v85_v31 = vld [vmem:[%s4323_s1 + $0x180] sm:$0xff] }
  0x23   :  { %1990 = vmatprep.subr.bf16.mxu0 %v1989_v40  ;;  %v2768_v26 = vld [vmem:[%s4324_s0 + $0x8] sm:$0xff]  ;;  %v87_v32 = vld [vmem:[%s4323_s1 + $0x190] sm:$0xff]  ;;  %v277_v33 = vld [vmem:[%s4323_s1 + $0x780] sm:$0xff]  ;;  %v2005_v35 = vpack.c.bf16 %v280_v24, %v278_v23  ;;  %v598_v13 = vcombine.high %v2753_v22, %v2753_v22 }
  0x24   :  { %v615_v28 = vcombine.high %v2768_v26, %v2768_v26  ;;  %v613_v34 = vcombine.high %v2763_v25, %v2763_v25  ;;  %v279_v36 = vld [vmem:[%s4323_s1 + $0x790] sm:$0xff]  ;;  %v90_v37 = vld [vmem:[%s4323_s1 + $0x1a8] sm:$0xff]  ;;  %v92_v38 = vld [vmem:[%s4323_s1 + $0x1b8] sm:$0xff]  ;;  %v1815_v42 = vpack.c.bf16 %v87_v32, %v85_v31 }
  0x25   :  { %1800 = vmatpush1.bf16.msra.mxu1 %v1799_v49  ;;  %v282_v40 = vld [vmem:[%s4323_s1 + $0x7a8] sm:$0xff]  ;;  %v284_v41 = vld [vmem:[%s4323_s1 + $0x7b8] sm:$0xff]  ;;  %v2007_v44 = vpack.c.bf16 %v279_v36, %v277_v33  ;;  %v1817_v45 = vpack.c.bf16 %v92_v38, %v90_v37  ;;  %v89_v46 = vld [vmem:[%s4323_s1 + $0x1a0] sm:$0xff] }
  0x26   :  { %1992 = vmatpush1.bf16.msra.mxu0 %v1991_v50  ;;  %1802 = vmatprep.subr.bf16.mxu1 %v1801_v51  ;;  %v2793_v39 = vrot.slane %v615_v28, %v2730_v11  ;;  %v91_v47 = vld [vmem:[%s4323_s1 + $0x1b0] sm:$0xff]  ;;  %v281_v48 = vld [vmem:[%s4323_s1 + $0x7a0] sm:$0xff]  ;;  %v2009_v49 = vpack.c.bf16 %v284_v41, %v282_v40  ;;  %v94_v51 = vld [vmem:[%s4323_s1 + $0x1c8] sm:$0xff] }
  0x27   :  { %1994 = vmatprep.subr.bf16.mxu0 %v1993_v55  ;;  %754 = vmatprep.mubr.f32.mxu1 %v613_v34  ;;  %v283_v50 = vld [vmem:[%s4323_s1 + $0x7b0] sm:$0xff]  ;;  %v96_v52 = vld [vmem:[%s4323_s1 + $0x1d8] sm:$0xff]  ;;  %v286_v53 = vld [vmem:[%s4323_s1 + $0x7c8] sm:$0xff]  ;;  %v1819_v55 = vpack.c.bf16 %v91_v47, %v89_v46 }
  0x28   :  { %v631_v43 = vcombine.high %v2793_v39, %v2793_v39  ;;  %v288_v54 = vld [vmem:[%s4323_s1 + $0x7d8] sm:$0xff]  ;;  %v2011_v56 = vpack.c.bf16 %v283_v50, %v281_v48  ;;  %v1821_v57 = vpack.c.bf16 %v96_v52, %v94_v51  ;;  %v93_v58 = vld [vmem:[%s4323_s1 + $0x1c0] sm:$0xff]  ;;  %v95_v59 = vld [vmem:[%s4323_s1 + $0x1d0] sm:$0xff] }
  0x29   :  { %1804 = vmatpush1.bf16.msra.mxu1 %v1803_v63  ;;  %v285_v60 = vld [vmem:[%s4323_s1 + $0x7c0] sm:$0xff]  ;;  %v2013_v62 = vpack.c.bf16 %v288_v54, %v286_v53  ;;  %v287_v63 = vld [vmem:[%s4323_s1 + $0x7d0] sm:$0xff]  ;;  %v290_v2 = vld [vmem:[%s4323_s1 + $0x7e8] sm:$0xff]  ;;  %v1823_v4 = vpack.c.bf16 %v95_v59, %v93_v58 }
  0x2a   :  { %1996 = vmatpush1.bf16.msra.mxu0 %v1995_v0  ;;  %1806 = vmatprep.subr.bf16.mxu1 %v1805_v1  ;;  %v98_v0 = vld [vmem:[%s4323_s1 + $0x1e8] sm:$0xff]  ;;  %v100_v1 = vld [vmem:[%s4323_s1 + $0x1f8] sm:$0xff]  ;;  %v97_v7 = vld [vmem:[%s4323_s1 + $0x1e0] sm:$0xff] }
  0x2b   :  { %1998 = vmatprep.subr.bf16.mxu0 %v1997_v5  ;;  %967 = vmatprep.mubr.f32.mxu0 %v631_v43  ;;  %v292_v3 = vld [vmem:[%s4323_s1 + $0x7f8] sm:$0xff]  ;;  %v2015_v5 = vpack.c.bf16 %v287_v63, %v285_v60  ;;  %v1825_v6 = vpack.c.bf16 %v100_v1, %v98_v0  ;;  %v99_v8 = vld [vmem:[%s4323_s1 + $0x1f0] sm:$0xff]  ;;  %v289_v9 = vld [vmem:[%s4323_s1 + $0x7e0] sm:$0xff] }
  0x2c   :  { %v2017_v10 = vpack.c.bf16 %v292_v3, %v290_v2  ;;  %v294_v16 = vld [vmem:[%s4323_s1 + $0x808] sm:$0xff]  ;;  %v296_v17 = vld [vmem:[%s4323_s1 + $0x818] sm:$0xff]  ;;  %v1827_v18 = vpack.c.bf16 %v99_v8, %v97_v7  ;;  %v101_v21 = vld [vmem:[%s4323_s1 + $0x200] sm:$0xff] }
  0x2d   :  { %1808 = vmatpush1.bf16.msra.mxu1 %v1807_v12  ;;  %v291_v12 = vld [vmem:[%s4323_s1 + $0x7f0] sm:$0xff]  ;;  %v293_v23 = vld [vmem:[%s4323_s1 + $0x800] sm:$0xff]  ;;  %v2021_v24 = vpack.c.bf16 %v296_v17, %v294_v16  ;;  %v106_v28 = vld [vmem:[%s4323_s1 + $0x228] sm:$0xff] }
  0x2e   :  { %2000 = vmatpush1.bf16.msra.mxu0 %v1999_v14  ;;  %1810 = vmatprep.subr.bf16.mxu1 %v1809_v15  ;;  %v102_v14 = vld [vmem:[%s4323_s1 + $0x208] sm:$0xff]  ;;  %v104_v15 = vld [vmem:[%s4323_s1 + $0x218] sm:$0xff]  ;;  %v103_v22 = vld [vmem:[%s4323_s1 + $0x210] sm:$0xff] }
  0x2f   :  { %2002 = vmatprep.subr.bf16.mxu0 %v2001_v19  ;;  %v2019_v19 = vpack.c.bf16 %v291_v12, %v289_v9  ;;  %v1829_v20 = vpack.c.bf16 %v104_v15, %v102_v14  ;;  %v298_v31 = vld [vmem:[%s4323_s1 + $0x828] sm:$0xff]  ;;  %v300_v32 = vld [vmem:[%s4323_s1 + $0x838] sm:$0xff]  ;;  %v1831_v33 = vpack.c.bf16 %v103_v22, %v101_v21  ;;  %v105_v36 = vld [vmem:[%s4323_s1 + $0x220] sm:$0xff] }
  0x30   :  { %v107_v37 = vld [vmem:[%s4323_s1 + $0x230] sm:$0xff]  ;;  %v297_v38 = vld [vmem:[%s4323_s1 + $0x820] sm:$0xff]  ;;  %v2025_v40 = vpack.c.bf16 %v300_v32, %v298_v31  ;;  %v112_v43 = vld [vmem:[%s4323_s1 + $0x258] sm:$0xff] }
  0x31   :  { %1812 = vmatpush1.bf16.msra.mxu1 %v1811_v27  ;;  %v295_v27 = vld [vmem:[%s4323_s1 + $0x810] sm:$0xff]  ;;  %v304_v46 = vld [vmem:[%s4323_s1 + $0x858] sm:$0xff]  ;;  %v1835_v47 = vpack.c.bf16 %v107_v37, %v105_v36  ;;  %v301_v51 = vld [vmem:[%s4323_s1 + $0x840] sm:$0xff] }
  0x32   :  { %2004 = vmatpush1.bf16.msra.mxu0 %v2003_v29  ;;  %1814 = vmatprep.subr.bf16.mxu1 %v1813_v30  ;;  %v108_v29 = vld [vmem:[%s4323_s1 + $0x238] sm:$0xff]  ;;  %v2896_v30 = vrot.slane %v598_v13, %v2730_v11  ;;  %v2023_v34 = vpack.c.bf16 %v295_v27, %v293_v23  ;;  %v299_v41 = vld [vmem:[%s4323_s1 + $0x830] sm:$0xff]  ;;  %v114_v53 = vld [vmem:[%s4323_s1 + $0x268] sm:$0xff] }
  0x33   :  { %2006 = vmatprep.subr.bf16.mxu0 %v2005_v35  ;;  %v1833_v35 = vpack.c.bf16 %v108_v29, %v106_v28  ;;  %v2027_v48 = vpack.c.bf16 %v299_v41, %v297_v38  ;;  %v111_v50 = vld [vmem:[%s4323_s1 + $0x250] sm:$0xff]  ;;  %v116_v54 = vld [vmem:[%s4323_s1 + $0x278] sm:$0xff]  ;;  %v113_v60 = vld [vmem:[%s4323_s1 + $0x260] sm:$0xff] }
  0x34   :  { %v1841_v59 = vpack.c.bf16 %v116_v54, %v114_v53  ;;  %v305_v63 = vld [vmem:[%s4323_s1 + $0x860] sm:$0xff]  ;;  %v307_v1 = vld [vmem:[%s4323_s1 + $0x870] sm:$0xff]  ;;  %v118_v2 = vld [vmem:[%s4323_s1 + $0x288] sm:$0xff] }
  0x35   :  { %1816 = vmatpush1.bf16.msra.mxu1 %v1815_v42  ;;  %v110_v42 = vld [vmem:[%s4323_s1 + $0x248] sm:$0xff]  ;;  %v120_v3 = vld [vmem:[%s4323_s1 + $0x298] sm:$0xff]  ;;  %v2035_v7 = vpack.c.bf16 %v307_v1, %v305_v63  ;;  %v117_v9 = vld [vmem:[%s4323_s1 + $0x280] sm:$0xff] }
  0x36   :  { %2008 = vmatpush1.bf16.msra.mxu0 %v2007_v44  ;;  %1818 = vmatprep.subr.bf16.mxu1 %v1817_v45  ;;  %v614_v44 = vcombine.high %v2896_v30, %v2896_v30  ;;  %v302_v45 = vld [vmem:[%s4323_s1 + $0x848] sm:$0xff]  ;;  %v1845_v8 = vpack.c.bf16 %v120_v3, %v118_v2  ;;  %v309_v12 = vld [vmem:[%s4323_s1 + $0x880] sm:$0xff]  ;;  %v311_v14 = vld [vmem:[%s4323_s1 + $0x890] sm:$0xff] }
  0x37   :  { %2010 = vmatprep.subr.bf16.mxu0 %v2009_v49  ;;  %v1837_v49 = vpack.c.bf16 %v112_v43, %v110_v42  ;;  %v2029_v52 = vpack.c.bf16 %v304_v46, %v302_v45  ;;  %v122_v15 = vld [vmem:[%s4323_s1 + $0x2a8] sm:$0xff]  ;;  %v124_v16 = vld [vmem:[%s4323_s1 + $0x2b8] sm:$0xff]  ;;  %v121_v22 = vld [vmem:[%s4323_s1 + $0x2a0] sm:$0xff] }
  0x38   :  { %v314_v17 = vld [vmem:[%s4323_s1 + $0x8a8] sm:$0xff]  ;;  %v1849_v21 = vpack.c.bf16 %v124_v16, %v122_v15  ;;  %v123_v23 = vld [vmem:[%s4323_s1 + $0x2b0] sm:$0xff]  ;;  %v128_v31 = vld [vmem:[%s4323_s1 + $0x2d8] sm:$0xff] }
  0x39   :  { %1820 = vmatpush1.bf16.msra.mxu1 %v1819_v55  ;;  %v306_v55 = vld [vmem:[%s4323_s1 + $0x868] sm:$0xff]  ;;  %v315_v28 = vld [vmem:[%s4323_s1 + $0x8b0] sm:$0xff]  ;;  %v325_v2 = vld [vmem:[%s4323_s1 + $0x900] sm:$0xff] }
  0x3a   :  { %2012 = vmatpush1.bf16.msra.mxu0 %v2011_v56  ;;  %1822 = vmatprep.subr.bf16.mxu1 %v1821_v57  ;;  %v308_v56 = vld [vmem:[%s4323_s1 + $0x878] sm:$0xff]  ;;  %v126_v29 = vld [vmem:[%s4323_s1 + $0x2c8] sm:$0xff]  ;;  %v127_v38 = vld [vmem:[%s4323_s1 + $0x2d0] sm:$0xff] }
  0x3b   :  { %2014 = vmatprep.subr.bf16.mxu0 %v2013_v62  ;;  %v115_v62 = vld [vmem:[%s4323_s1 + $0x270] sm:$0xff]  ;;  %v2033_v0 = vpack.c.bf16 %v308_v56, %v306_v55  ;;  %v318_v32 = vld [vmem:[%s4323_s1 + $0x8c8] sm:$0xff]  ;;  %v1853_v37 = vpack.c.bf16 %v128_v31, %v126_v29  ;;  %v329_v15 = vld [vmem:[%s4323_s1 + $0x920] sm:$0xff] }
  0x3c   :  { %v319_v41 = vld [vmem:[%s4323_s1 + $0x8d0] sm:$0xff]  ;;  %v130_v43 = vld [vmem:[%s4323_s1 + $0x2e8] sm:$0xff]  ;;  %v333_v29 = vld [vmem:[%s4323_s1 + $0x940] sm:$0xff] }
  0x3d   :  { %1824 = vmatpush1.bf16.msra.mxu1 %v1823_v4  ;;  %v310_v4 = vld [vmem:[%s4323_s1 + $0x888] sm:$0xff]  ;;  %v3049_v45 = vld [vmem:[%s4324_s0 + $0x10] sm:$0xff] }
  0x3e   :  { %2016 = vmatpush1.bf16.msra.mxu0 %v2015_v5  ;;  %1826 = vmatprep.subr.bf16.mxu1 %v1825_v6  ;;  %v312_v5 = vld [vmem:[%s4323_s1 + $0x898] sm:$0xff]  ;;  %v1843_v6 = vpack.c.bf16 %v115_v62, %v113_v60  ;;  %v322_v46 = vld [vmem:[%s4323_s1 + $0x8e8] sm:$0xff]  ;;  %v323_v55 = vld [vmem:[%s4323_s1 + $0x8f0] sm:$0xff] }
  0x3f   :  { %2018 = vmatprep.subr.bf16.mxu0 %v2017_v10  ;;  %v119_v10 = vld [vmem:[%s4323_s1 + $0x290] sm:$0xff]  ;;  %v2037_v13 = vpack.c.bf16 %v312_v5, %v310_v4  ;;  %v134_v56 = vld [vmem:[%s4323_s1 + $0x308] sm:$0xff] }
  0x40   :  { %v135_v1 = vld [vmem:[%s4323_s1 + $0x310] sm:$0xff]  ;;  %v138_v5 = vld [vmem:[%s4323_s1 + $0x328] sm:$0xff] }
  0x41   :  { %1828 = vmatpush1.bf16.msra.mxu1 %v1827_v18  ;;  %v316_v18 = vld [vmem:[%s4323_s1 + $0x8b8] sm:$0xff]  ;;  %v327_v4 = vld [vmem:[%s4323_s1 + $0x910] sm:$0xff] }
  0x42   :  { %2020 = vmatpush1.bf16.msra.mxu0 %v2019_v19  ;;  %1830 = vmatprep.subr.bf16.mxu1 %v1829_v20  ;;  %v1847_v19 = vpack.c.bf16 %v119_v10, %v117_v9  ;;  %v2039_v20 = vpack.c.bf16 %v311_v14, %v309_v12  ;;  %v2041_v27 = vpack.c.bf16 %v316_v18, %v314_v17  ;;  %v139_v14 = vld [vmem:[%s4323_s1 + $0x330] sm:$0xff]  ;;  %v142_v18 = vld [vmem:[%s4323_s1 + $0x348] sm:$0xff] }
  0x43   :  { %2022 = vmatprep.subr.bf16.mxu0 %v2021_v24  ;;  %v313_v24 = vld [vmem:[%s4323_s1 + $0x8a0] sm:$0xff]  ;;  %v2055_v10 = vpack.c.bf16 %v327_v4, %v325_v2  ;;  %v331_v17 = vld [vmem:[%s4323_s1 + $0x930] sm:$0xff] }
  0x44   :  { %755 = vmatmul.mubr.f32.vlgmr.msra.gmra.mrb[0].mxu1 %v2763_v25  ;;  %v109_v25 = vld [vmem:[%s4323_s1 + $0x240] sm:$0xff]  ;;  %v2043_v36 = vpack.c.bf16 %v315_v28, %v313_v24  ;;  %v143_v28 = vld [vmem:[%s4323_s1 + $0x350] sm:$0xff] }
  0x45   :  { %1832 = vmatpush1.bf16.msra.mxu1 %v1831_v33  ;;  %968 = vmatmul.mubr.f32.vlgmr.msra.gmra.mrb[0].mxu0 %v2793_v39  ;;  %v303_v39 = vld [vmem:[%s4323_s1 + $0x850] sm:$0xff]  ;;  %v1839_v57 = vpack.c.bf16 %v111_v50, %v109_v25  ;;  %v320_v33 = vld [vmem:[%s4323_s1 + $0x8d8] sm:$0xff]  ;;  %v153_v2 = vld [vmem:[%s4323_s1 + $0x3a0] sm:$0xff] }
  0x46   :  { %2024 = vmatpush1.bf16.msra.mxu0 %v2023_v34  ;;  %1834 = vmatprep.subr.bf16.mxu1 %v1833_v35  ;;  %v2031_v58 = vpack.c.bf16 %v303_v39, %v301_v51  ;;  %v1851_v34 = vpack.c.bf16 %v123_v23, %v121_v22  ;;  %v125_v35 = vld [vmem:[%s4323_s1 + $0x2c0] sm:$0xff]  ;;  %v2045_v42 = vpack.c.bf16 %v320_v33, %v318_v32  ;;  %v335_v32 = vld [vmem:[%s4323_s1 + $0x950] sm:$0xff]  ;;  %v146_v33 = vld [vmem:[%s4323_s1 + $0x368] sm:$0xff] }
  0x47   :  { %2026 = vmatprep.subr.bf16.mxu0 %v2025_v40  ;;  %825 = vmatprep.mubr.f32.mxu1 %v614_v44  ;;  %v317_v40 = vld [vmem:[%s4323_s1 + $0x8c0] sm:$0xff]  ;;  %v132_v44 = vld [vmem:[%s4323_s1 + $0x2f8] sm:$0xff]  ;;  %v2059_v23 = vpack.c.bf16 %v331_v17, %v329_v15 }
  0x48   :  { %v2047_v25 = vpack.c.bf16 %v319_v41, %v317_v40  ;;  %v1857_v50 = vpack.c.bf16 %v132_v44, %v130_v43  ;;  %v129_v51 = vld [vmem:[%s4323_s1 + $0x2e0] sm:$0xff] }
  0x49   :  { %1836 = vmatpush1.bf16.msra.mxu1 %v1835_v47  ;;  %v324_v47 = vld [vmem:[%s4323_s1 + $0x8f8] sm:$0xff]  ;;  %v321_v39 = vld [vmem:[%s4323_s1 + $0x8e0] sm:$0xff] }
  0x4a   :  { %2028 = vmatpush1.bf16.msra.mxu0 %v2027_v48  ;;  %1838 = vmatprep.subr.bf16.mxu1 %v1837_v49  ;;  %v3059_v48 = vrot.slane %v3049_v45, %v2730_v11  ;;  %v1855_v49 = vpack.c.bf16 %v127_v38, %v125_v35  ;;  %v2049_v54 = vpack.c.bf16 %v324_v47, %v322_v46  ;;  %v338_v35 = vld [vmem:[%s4323_s1 + $0x968] sm:$0xff]  ;;  %v145_v41 = vld [vmem:[%s4323_s1 + $0x360] sm:$0xff]  ;;  %v339_v46 = vld [vmem:[%s4323_s1 + $0x970] sm:$0xff] }
  0x4b   :  { %2030 = vmatprep.subr.bf16.mxu0 %v2029_v52  ;;  %v131_v52 = vld [vmem:[%s4323_s1 + $0x2f0] sm:$0xff]  ;;  %v2051_v62 = vpack.c.bf16 %v323_v55, %v321_v39  ;;  %v2063_v38 = vpack.c.bf16 %v335_v32, %v333_v29  ;;  %v337_v43 = vld [vmem:[%s4323_s1 + $0x960] sm:$0xff]  ;;  %v150_v47 = vld [vmem:[%s4323_s1 + $0x388] sm:$0xff] }
  0x4c   :  { %v647_v53 = vcombine.high %v3059_v48, %v3059_v48  ;;  %v1859_v60 = vpack.c.bf16 %v131_v52, %v129_v51  ;;  %v2067_v52 = vpack.c.bf16 %v339_v46, %v337_v43  ;;  %v341_v55 = vld [vmem:[%s4323_s1 + $0x980] sm:$0xff]  ;;  %v167_v46 = vld [vmem:[%s4323_s1 + $0x410] sm:$0xff] }
  0x4d   :  { %1840 = vmatpush1.bf16.msra.mxu1 %v1839_v57  ;;  %v136_v57 = vld [vmem:[%s4323_s1 + $0x318] sm:$0xff]  ;;  %v345_v4 = vld [vmem:[%s4323_s1 + $0x9a0] sm:$0xff] }
  0x4e   :  { %2032 = vmatpush1.bf16.msra.mxu0 %v2031_v58  ;;  %1842 = vmatprep.subr.bf16.mxu1 %v1841_v59  ;;  %v326_v58 = vld [vmem:[%s4323_s1 + $0x908] sm:$0xff]  ;;  %v328_v59 = vld [vmem:[%s4323_s1 + $0x918] sm:$0xff]  ;;  %v1861_v63 = vpack.c.bf16 %v136_v57, %v134_v56  ;;  %v343_v57 = vld [vmem:[%s4323_s1 + $0x990] sm:$0xff] }
  0x4f   :  { %2034 = vmatprep.subr.bf16.mxu0 %v2033_v0  ;;  %1038 = vmatprep.mubr.f32.mxu0 %v647_v53  ;;  %v133_v0 = vld [vmem:[%s4323_s1 + $0x300] sm:$0xff]  ;;  %v2053_v3 = vpack.c.bf16 %v328_v59, %v326_v58  ;;  %v154_v58 = vld [vmem:[%s4323_s1 + $0x3a8] sm:$0xff]  ;;  %v156_v59 = vld [vmem:[%s4323_s1 + $0x3b8] sm:$0xff] }
  0x50   :  { %v1863_v9 = vpack.c.bf16 %v135_v1, %v133_v0  ;;  %v149_v53 = vld [vmem:[%s4323_s1 + $0x380] sm:$0xff]  ;;  %v2071_v0 = vpack.c.bf16 %v343_v57, %v341_v55  ;;  %v1881_v1 = vpack.c.bf16 %v156_v59, %v154_v58  ;;  %v171_v57 = vld [vmem:[%s4323_s1 + $0x430] sm:$0xff] }
  0x51   :  { %1844 = vmatpush1.bf16.msra.mxu1 %v1843_v6  ;;  %v140_v6 = vld [vmem:[%s4323_s1 + $0x338] sm:$0xff]  ;;  %v157_v15 = vld [vmem:[%s4323_s1 + $0x3c0] sm:$0xff] }
  0x52   :  { %2036 = vmatpush1.bf16.msra.mxu0 %v2035_v7  ;;  %1846 = vmatprep.subr.bf16.mxu1 %v1845_v8  ;;  %v330_v7 = vld [vmem:[%s4323_s1 + $0x928] sm:$0xff]  ;;  %v332_v8 = vld [vmem:[%s4323_s1 + $0x938] sm:$0xff]  ;;  %v1865_v12 = vpack.c.bf16 %v140_v6, %v138_v5  ;;  %v347_v6 = vld [vmem:[%s4323_s1 + $0x9b0] sm:$0xff] }
  0x53   :  { %2038 = vmatprep.subr.bf16.mxu0 %v2037_v13  ;;  %v137_v13 = vld [vmem:[%s4323_s1 + $0x320] sm:$0xff]  ;;  %v2057_v16 = vpack.c.bf16 %v332_v8, %v330_v7  ;;  %v158_v7 = vld [vmem:[%s4323_s1 + $0x3c8] sm:$0xff]  ;;  %v160_v8 = vld [vmem:[%s4323_s1 + $0x3d8] sm:$0xff] }
  0x54   :  { %v1867_v22 = vpack.c.bf16 %v139_v14, %v137_v13  ;;  %v2075_v13 = vpack.c.bf16 %v347_v6, %v345_v4  ;;  %v1885_v14 = vpack.c.bf16 %v160_v8, %v158_v7  ;;  %v349_v17 = vld [vmem:[%s4323_s1 + $0x9c0] sm:$0xff]  ;;  %v175_v7 = vld [vmem:[%s4323_s1 + $0x450] sm:$0xff] }
  0x55   :  { %1848 = vmatpush1.bf16.msra.mxu1 %v1847_v19  ;;  %v144_v19 = vld [vmem:[%s4323_s1 + $0x358] sm:$0xff]  ;;  %v161_v29 = vld [vmem:[%s4323_s1 + $0x3e0] sm:$0xff] }
  0x56   :  { %2040 = vmatpush1.bf16.msra.mxu0 %v2039_v20  ;;  %1850 = vmatprep.subr.bf16.mxu1 %v1849_v21  ;;  %v334_v20 = vld [vmem:[%s4323_s1 + $0x948] sm:$0xff]  ;;  %v336_v21 = vld [vmem:[%s4323_s1 + $0x958] sm:$0xff]  ;;  %v1869_v24 = vpack.c.bf16 %v144_v19, %v142_v18  ;;  %v351_v19 = vld [vmem:[%s4323_s1 + $0x9d0] sm:$0xff] }
  0x57   :  { %2042 = vmatprep.subr.bf16.mxu0 %v2041_v27  ;;  %v141_v27 = vld [vmem:[%s4323_s1 + $0x340] sm:$0xff]  ;;  %v2061_v31 = vpack.c.bf16 %v336_v21, %v334_v20  ;;  %v162_v20 = vld [vmem:[%s4323_s1 + $0x3e8] sm:$0xff]  ;;  %v164_v21 = vld [vmem:[%s4323_s1 + $0x3f8] sm:$0xff] }
  0x58   :  { %v353_v32 = vld [vmem:[%s4323_s1 + $0x9e0] sm:$0xff] }
  0x59   :  { %1852 = vmatpush1.bf16.msra.mxu1 %v1851_v34  ;;  %v148_v34 = vld [vmem:[%s4323_s1 + $0x378] sm:$0xff]  ;;  %v361_v58 = vld [vmem:[%s4323_s1 + $0xa20] sm:$0xff] }
  0x5a   :  { %2044 = vmatpush1.bf16.msra.mxu0 %v2043_v36  ;;  %1854 = vmatprep.subr.bf16.mxu1 %v1853_v37  ;;  %v340_v36 = vld [vmem:[%s4323_s1 + $0x978] sm:$0xff]  ;;  %v1871_v37 = vpack.c.bf16 %v143_v28, %v141_v27  ;;  %v1873_v40 = vpack.c.bf16 %v148_v34, %v146_v33  ;;  %v2079_v27 = vpack.c.bf16 %v351_v19, %v349_v17  ;;  %v355_v34 = vld [vmem:[%s4323_s1 + $0x9f0] sm:$0xff]  ;;  %v365_v8 = vld [vmem:[%s4323_s1 + $0xa40] sm:$0xff] }
  0x5b   :  { %2046 = vmatprep.subr.bf16.mxu0 %v2045_v42  ;;  %v147_v42 = vld [vmem:[%s4323_s1 + $0x370] sm:$0xff]  ;;  %v2065_v44 = vpack.c.bf16 %v340_v36, %v338_v35  ;;  %v1889_v28 = vpack.c.bf16 %v164_v21, %v162_v20  ;;  %v166_v35 = vld [vmem:[%s4323_s1 + $0x408] sm:$0xff]  ;;  %v168_v36 = vld [vmem:[%s4323_s1 + $0x418] sm:$0xff] }
  0x5c   :  { %v1875_v51 = vpack.c.bf16 %v147_v42, %v145_v41  ;;  %v2083_v42 = vpack.c.bf16 %v355_v34, %v353_v32  ;;  %v1893_v43 = vpack.c.bf16 %v168_v36, %v166_v35  ;;  %v179_v19 = vld [vmem:[%s4323_s1 + $0x470] sm:$0xff]  ;;  %v369_v20 = vld [vmem:[%s4323_s1 + $0xa60] sm:$0xff] }
  0x5d   :  { %1856 = vmatpush1.bf16.msra.mxu1 %v1855_v49  ;;  %v152_v49 = vld [vmem:[%s4323_s1 + $0x398] sm:$0xff]  ;;  %v183_v34 = vld [vmem:[%s4323_s1 + $0x490] sm:$0xff]  ;;  %v373_v35 = vld [vmem:[%s4323_s1 + $0xa80] sm:$0xff] }
  0x5e   :  { %2048 = vmatpush1.bf16.msra.mxu0 %v2047_v25  ;;  %1858 = vmatprep.subr.bf16.mxu1 %v1857_v50  ;;  %v342_v25 = vld [vmem:[%s4323_s1 + $0x988] sm:$0xff]  ;;  %v344_v50 = vld [vmem:[%s4323_s1 + $0x998] sm:$0xff]  ;;  %v1877_v39 = vpack.c.bf16 %v152_v49, %v150_v47  ;;  %v357_v47 = vld [vmem:[%s4323_s1 + $0xa00] sm:$0xff] }
  0x5f   :  { %2050 = vmatprep.subr.bf16.mxu0 %v2049_v54  ;;  %v151_v54 = vld [vmem:[%s4323_s1 + $0x390] sm:$0xff]  ;;  %v2069_v56 = vpack.c.bf16 %v344_v50, %v342_v25  ;;  %v170_v25 = vld [vmem:[%s4323_s1 + $0x428] sm:$0xff]  ;;  %v172_v50 = vld [vmem:[%s4323_s1 + $0x438] sm:$0xff] }
  0x60   :  { %v359_v49 = vld [vmem:[%s4323_s1 + $0xa10] sm:$0xff] }
  0x61   :  { %1860 = vmatpush1.bf16.msra.mxu1 %v1859_v60  ;;  %v346_v60 = vld [vmem:[%s4323_s1 + $0x9a8] sm:$0xff]  ;;  %v2087_v55 = vpack.c.bf16 %v359_v49, %v357_v47  ;;  %v185_v47 = vld [vmem:[%s4323_s1 + $0x4a0] sm:$0xff] }
  0x62   :  { %2052 = vmatpush1.bf16.msra.mxu0 %v2051_v62  ;;  %1862 = vmatprep.subr.bf16.mxu1 %v1861_v63  ;;  %v348_v62 = vld [vmem:[%s4323_s1 + $0x9b8] sm:$0xff]  ;;  %v1879_v63 = vpack.c.bf16 %v151_v54, %v149_v53  ;;  %v377_v49 = vld [vmem:[%s4323_s1 + $0xaa0] sm:$0xff] }
  0x63   :  { %2054 = vmatprep.subr.bf16.mxu0 %v2053_v3  ;;  %v155_v3 = vld [vmem:[%s4323_s1 + $0x3b0] sm:$0xff]  ;;  %v2073_v5 = vpack.c.bf16 %v348_v62, %v346_v60  ;;  %v174_v62 = vld [vmem:[%s4323_s1 + $0x448] sm:$0xff] }
  0x64   :  { %v363_v60 = vld [vmem:[%s4323_s1 + $0xa30] sm:$0xff] }
  0x65   :  { %1864 = vmatpush1.bf16.msra.mxu1 %v1863_v9  ;;  %v350_v9 = vld [vmem:[%s4323_s1 + $0x9c8] sm:$0xff] }
  0x66   :  { %2056 = vmatpush1.bf16.msra.mxu0 %v2055_v10  ;;  %1866 = vmatprep.subr.bf16.mxu1 %v1865_v12  ;;  %v352_v10 = vld [vmem:[%s4323_s1 + $0x9d8] sm:$0xff]  ;;  %v1883_v12 = vpack.c.bf16 %v155_v3, %v153_v2 }
  0x67   :  { %2058 = vmatprep.subr.bf16.mxu0 %v2057_v16  ;;  %v159_v16 = vld [vmem:[%s4323_s1 + $0x3d0] sm:$0xff]  ;;  %v2077_v18 = vpack.c.bf16 %v352_v10, %v350_v9  ;;  %v368_v2 = vld [vmem:[%s4323_s1 + $0xa58] sm:$0xff]  ;;  %v178_v10 = vld [vmem:[%s4323_s1 + $0x468] sm:$0xff] }
  0x69   :  { %1868 = vmatpush1.bf16.msra.mxu1 %v1867_v22  ;;  %v354_v22 = vld [vmem:[%s4323_s1 + $0x9e8] sm:$0xff] }
  0x6a   :  { %2060 = vmatpush1.bf16.msra.mxu0 %v2059_v23  ;;  %1870 = vmatprep.subr.bf16.mxu1 %v1869_v24  ;;  %v356_v23 = vld [vmem:[%s4323_s1 + $0x9f8] sm:$0xff]  ;;  %v1887_v24 = vpack.c.bf16 %v159_v16, %v157_v15 }
  0x6b   :  { %2062 = vmatprep.subr.bf16.mxu0 %v2061_v31  ;;  %v163_v31 = vld [vmem:[%s4323_s1 + $0x3f0] sm:$0xff]  ;;  %v2081_v33 = vpack.c.bf16 %v356_v23, %v354_v22  ;;  %v182_v23 = vld [vmem:[%s4323_s1 + $0x488] sm:$0xff] }
  0x6c   :  { %v1891_v41 = vpack.c.bf16 %v163_v31, %v161_v29  ;;  %v371_v22 = vld [vmem:[%s4323_s1 + $0xa70] sm:$0xff] }
  0x6d   :  { %1872 = vmatpush1.bf16.msra.mxu1 %v1871_v37  ;;  %v358_v37 = vld [vmem:[%s4323_s1 + $0xa08] sm:$0xff]  ;;  %v2099_v31 = vpack.c.bf16 %v371_v22, %v369_v20  ;;  %v389_v20 = vld [vmem:[%s4323_s1 + $0xb00] sm:$0xff]  ;;  %v391_v22 = vld [vmem:[%s4323_s1 + $0xb10] sm:$0xff] }
  0x6e   :  { %2064 = vmatpush1.bf16.msra.mxu0 %v2063_v38  ;;  %1874 = vmatprep.subr.bf16.mxu1 %v1873_v40  ;;  %v360_v38 = vld [vmem:[%s4323_s1 + $0xa18] sm:$0xff]  ;;  %v632_v40 = vcombine.high %v3049_v45, %v3049_v45 }
  0x6f   :  { %2066 = vmatprep.subr.bf16.mxu0 %v2065_v44  ;;  %v165_v44 = vld [vmem:[%s4323_s1 + $0x400] sm:$0xff]  ;;  %v2085_v45 = vpack.c.bf16 %v360_v38, %v358_v37  ;;  %v375_v37 = vld [vmem:[%s4323_s1 + $0xa90] sm:$0xff]  ;;  %v186_v38 = vld [vmem:[%s4323_s1 + $0x4a8] sm:$0xff] }
  0x70   :  { %v3310_v53 = vrot.slane %v632_v40, %v2730_v11  ;;  %v1895_v54 = vpack.c.bf16 %v167_v46, %v165_v44  ;;  %v188_v40 = vld [vmem:[%s4323_s1 + $0x4b8] sm:$0xff]  ;;  %v2103_v44 = vpack.c.bf16 %v375_v37, %v373_v35  ;;  %v393_v35 = vld [vmem:[%s4323_s1 + $0xb20] sm:$0xff]  ;;  %v395_v37 = vld [vmem:[%s4323_s1 + $0xb30] sm:$0xff] }
  0x71   :  { %1876 = vmatpush1.bf16.msra.mxu1 %v1875_v51  ;;  %v3301_v51 = vrot.slane %v2768_v26, %v2730_v11  ;;  %v169_v26 = vld [vmem:[%s4323_s1 + $0x420] sm:$0xff]  ;;  %v1913_v46 = vpack.c.bf16 %v188_v40, %v186_v38  ;;  %v206_v38 = vld [vmem:[%s4323_s1 + $0x548] sm:$0xff]  ;;  %v208_v40 = vld [vmem:[%s4323_s1 + $0x558] sm:$0xff] }
  0x72   :  { %2068 = vmatpush1.bf16.msra.mxu0 %v2067_v52  ;;  %1878 = vmatprep.subr.bf16.mxu1 %v1877_v39  ;;  %v362_v52 = vld [vmem:[%s4323_s1 + $0xa28] sm:$0xff]  ;;  %v364_v39 = vld [vmem:[%s4323_s1 + $0xa38] sm:$0xff]  ;;  %v648_v3 = vcombine.high %v3310_v53, %v3310_v53  ;;  %v1899_v4 = vpack.c.bf16 %v171_v57, %v169_v26 }
  0x73   :  { %2070 = vmatprep.subr.bf16.mxu0 %v2069_v56  ;;  %v1897_v56 = vpack.c.bf16 %v172_v50, %v170_v25  ;;  %v2089_v59 = vpack.c.bf16 %v364_v39, %v362_v52  ;;  %v379_v50 = vld [vmem:[%s4323_s1 + $0xab0] sm:$0xff]  ;;  %v190_v52 = vld [vmem:[%s4323_s1 + $0x4c8] sm:$0xff]  ;;  %v192_v39 = vld [vmem:[%s4323_s1 + $0x4d8] sm:$0xff] }
  0x74   :  { %v2107_v26 = vpack.c.bf16 %v379_v50, %v377_v49  ;;  %v1917_v57 = vpack.c.bf16 %v192_v39, %v190_v52  ;;  %v397_v49 = vld [vmem:[%s4323_s1 + $0xb40] sm:$0xff]  ;;  %v399_v50 = vld [vmem:[%s4323_s1 + $0xb50] sm:$0xff]  ;;  %v210_v52 = vld [vmem:[%s4323_s1 + $0x568] sm:$0xff] }
  0x75   :  { %1880 = vmatpush1.bf16.msra.mxu1 %v1879_v63  ;;  %v176_v63 = vld [vmem:[%s4323_s1 + $0x458] sm:$0xff] }
  0x76   :  { %2072 = vmatpush1.bf16.msra.mxu0 %v2071_v0  ;;  %1882 = vmatprep.subr.bf16.mxu1 %v1881_v1  ;;  %v630_v0 = vcombine.high %v3301_v51, %v3301_v51  ;;  %v366_v1 = vld [vmem:[%s4323_s1 + $0xa48] sm:$0xff]  ;;  %v1901_v6 = vpack.c.bf16 %v176_v63, %v174_v62  ;;  %v383_v63 = vld [vmem:[%s4323_s1 + $0xad0] sm:$0xff]  ;;  %v212_v39 = vld [vmem:[%s4323_s1 + $0x578] sm:$0xff] }
  0x77   :  { %2074 = vmatprep.subr.bf16.mxu0 %v2073_v5  ;;  %v2091_v5 = vpack.c.bf16 %v363_v60, %v361_v58  ;;  %v2093_v9 = vpack.c.bf16 %v368_v2, %v366_v1  ;;  %v189_v58 = vld [vmem:[%s4323_s1 + $0x4c0] sm:$0xff]  ;;  %v196_v1 = vld [vmem:[%s4323_s1 + $0x4f8] sm:$0xff]  ;;  %v386_v2 = vld [vmem:[%s4323_s1 + $0xae8] sm:$0xff] }
  0x78   :  { %v381_v60 = vld [vmem:[%s4323_s1 + $0xac0] sm:$0xff] }
  0x79   :  { %1884 = vmatpush1.bf16.msra.mxu1 %v1883_v12  ;;  %v180_v12 = vld [vmem:[%s4323_s1 + $0x478] sm:$0xff] }
  0x7a   :  { %2076 = vmatpush1.bf16.msra.mxu0 %v2075_v13  ;;  %1886 = vmatprep.subr.bf16.mxu1 %v1885_v14  ;;  %v370_v13 = vld [vmem:[%s4323_s1 + $0xa68] sm:$0xff]  ;;  %v372_v14 = vld [vmem:[%s4323_s1 + $0xa78] sm:$0xff]  ;;  %v1905_v17 = vpack.c.bf16 %v180_v12, %v178_v10 }
  0x7b   :  { %2078 = vmatprep.subr.bf16.mxu0 %v2077_v18  ;;  %v177_v18 = vld [vmem:[%s4323_s1 + $0x460] sm:$0xff]  ;;  %v2097_v21 = vpack.c.bf16 %v372_v14, %v370_v13  ;;  %v198_v10 = vld [vmem:[%s4323_s1 + $0x508] sm:$0xff]  ;;  %v200_v12 = vld [vmem:[%s4323_s1 + $0x518] sm:$0xff] }
  0x7c   :  { %v1907_v29 = vpack.c.bf16 %v179_v19, %v177_v18  ;;  %v390_v13 = vld [vmem:[%s4323_s1 + $0xb08] sm:$0xff]  ;;  %v392_v14 = vld [vmem:[%s4323_s1 + $0xb18] sm:$0xff]  ;;  %v197_v18 = vld [vmem:[%s4323_s1 + $0x500] sm:$0xff] }
  0x7d   :  { %1888 = vmatpush1.bf16.msra.mxu1 %v1887_v24  ;;  %v184_v24 = vld [vmem:[%s4323_s1 + $0x498] sm:$0xff]  ;;  %v199_v19 = vld [vmem:[%s4323_s1 + $0x510] sm:$0xff] }
  0x7e   :  { %2080 = vmatpush1.bf16.msra.mxu0 %v2079_v27  ;;  %1890 = vmatprep.subr.bf16.mxu1 %v1889_v28  ;;  %v374_v27 = vld [vmem:[%s4323_s1 + $0xa88] sm:$0xff]  ;;  %v376_v28 = vld [vmem:[%s4323_s1 + $0xa98] sm:$0xff]  ;;  %v1909_v32 = vpack.c.bf16 %v184_v24, %v182_v23 }
  0x7f   :  { %2082 = vmatprep.subr.bf16.mxu0 %v2081_v33  ;;  %v181_v33 = vld [vmem:[%s4323_s1 + $0x480] sm:$0xff]  ;;  %v2101_v36 = vpack.c.bf16 %v376_v28, %v374_v27  ;;  %v202_v23 = vld [vmem:[%s4323_s1 + $0x528] sm:$0xff]  ;;  %v204_v24 = vld [vmem:[%s4323_s1 + $0x538] sm:$0xff] }
  0x80   :  { %v394_v27 = vld [vmem:[%s4323_s1 + $0xb28] sm:$0xff]  ;;  %v396_v28 = vld [vmem:[%s4323_s1 + $0xb38] sm:$0xff] }
  0x81   :  { %1892 = vmatpush1.bf16.msra.mxu1 %v1891_v41  ;;  %v378_v41 = vld [vmem:[%s4323_s1 + $0xaa8] sm:$0xff] }
  0x82   :  { %2084 = vmatpush1.bf16.msra.mxu0 %v2083_v42  ;;  %1894 = vmatprep.subr.bf16.mxu1 %v1893_v43  ;;  %v380_v42 = vld [vmem:[%s4323_s1 + $0xab8] sm:$0xff]  ;;  %v1911_v43 = vpack.c.bf16 %v183_v34, %v181_v33  ;;  %v201_v33 = vld [vmem:[%s4323_s1 + $0x520] sm:$0xff]  ;;  %v203_v34 = vld [vmem:[%s4323_s1 + $0x530] sm:$0xff] }
  0x83   :  { %2086 = vmatprep.subr.bf16.mxu0 %v2085_v45  ;;  %v187_v45 = vld [vmem:[%s4323_s1 + $0x4b0] sm:$0xff]  ;;  %v2105_v25 = vpack.c.bf16 %v380_v42, %v378_v41  ;;  %v398_v41 = vld [vmem:[%s4323_s1 + $0xb48] sm:$0xff]  ;;  %v400_v42 = vld [vmem:[%s4323_s1 + $0xb58] sm:$0xff] }
  0x84   :  { %826 = vmatmul.mubr.f32.vlgmr.msra.gmra.mrb[0].mxu1 %v2896_v30  ;;  %v173_v30 = vld [vmem:[%s4323_s1 + $0x440] sm:$0xff] }
  0x85   :  { %1896 = vmatpush1.bf16.msra.mxu1 %v1895_v54  ;;  %1039 = vmatmul.mubr.f32.vlgmr.msra.gmra.mrb[0].mxu0 %v3059_v48  ;;  %v367_v48 = vld [vmem:[%s4323_s1 + $0xa50] sm:$0xff]  ;;  %v1903_v15 = vpack.c.bf16 %v175_v7, %v173_v30  ;;  %v382_v54 = vld [vmem:[%s4323_s1 + $0xac8] sm:$0xff]  ;;  %v193_v30 = vld [vmem:[%s4323_s1 + $0x4e0] sm:$0xff] }
  0x86   :  { %2088 = vmatpush1.bf16.msra.mxu0 %v2087_v55  ;;  %1898 = vmatprep.subr.bf16.mxu1 %v1897_v56  ;;  %v2095_v16 = vpack.c.bf16 %v367_v48, %v365_v8  ;;  %v384_v55 = vld [vmem:[%s4323_s1 + $0xad8] sm:$0xff]  ;;  %v1915_v56 = vpack.c.bf16 %v187_v45, %v185_v47  ;;  %v195_v7 = vld [vmem:[%s4323_s1 + $0x4f0] sm:$0xff]  ;;  %v385_v8 = vld [vmem:[%s4323_s1 + $0xae0] sm:$0xff] }
  0x87   :  { %2090 = vmatprep.subr.bf16.mxu0 %v2089_v59  ;;  %896 = vmatprep.mubr.f32.mxu1 %v630_v0  ;;  %v191_v59 = vld [vmem:[%s4323_s1 + $0x4d0] sm:$0xff]  ;;  %v2109_v62 = vpack.c.bf16 %v384_v55, %v382_v54  ;;  %v194_v0 = vld [vmem:[%s4323_s1 + $0x4e8] sm:$0xff]  ;;  %v205_v47 = vld [vmem:[%s4323_s1 + $0x540] sm:$0xff] }
  0x88   :  { %1109 = vmatprep.mubr.f32.mxu0 %v648_v3  ;;  %v388_v3 = vld [vmem:[%s4323_s1 + $0xaf8] sm:$0xff]  ;;  %v387_v48 = vld [vmem:[%s4323_s1 + $0xaf0] sm:$0xff]  ;;  %v402_v54 = vld [vmem:[%s4323_s1 + $0xb68] sm:$0xff] }
  0x89   :  { %1900 = vmatpush1.bf16.msra.mxu1 %v1899_v4  ;;  %v1919_v4 = vpack.c.bf16 %v191_v59, %v189_v58  ;;  %v207_v45 = vld [vmem:[%s4323_s1 + $0x550] sm:$0xff]  ;;  %v404_v55 = vld [vmem:[%s4323_s1 + $0xb78] sm:$0xff]  ;;  %v209_v58 = vld [vmem:[%s4323_s1 + $0x560] sm:$0xff] }
  0x8a   :  { %2092 = vmatpush1.bf16.msra.mxu0 %v2091_v5  ;;  %1902 = vmatprep.subr.bf16.mxu1 %v1901_v6  ;;  %v2111_v5 = vpack.c.bf16 %v383_v63, %v381_v60  ;;  %v1921_v6 = vpack.c.bf16 %v196_v1, %v194_v0  ;;  %v211_v59 = vld [vmem:[%s4323_s1 + $0x570] sm:$0xff]  ;;  %v401_v60 = vld [vmem:[%s4323_s1 + $0xb60] sm:$0xff]  ;;  %v214_v0 = vld [vmem:[%s4323_s1 + $0x588] sm:$0xff] }
  0x8b   :  { %2094 = vmatprep.subr.bf16.mxu0 %v2093_v9  ;;  %v2113_v9 = vpack.c.bf16 %v388_v3, %v386_v2  ;;  %v403_v63 = vld [vmem:[%s4323_s1 + $0xb70] sm:$0xff]  ;;  %v216_v1 = vld [vmem:[%s4323_s1 + $0x598] sm:$0xff]  ;;  %v406_v2 = vld [vmem:[%s4323_s1 + $0xb88] sm:$0xff] }
  0x8c   :  { %v408_v3 = vld [vmem:[%s4323_s1 + $0xb98] sm:$0xff] }
  0x8d   :  { %1904 = vmatpush1.bf16.msra.mxu1 %v1903_v15  ;;  %v1923_v15 = vpack.c.bf16 %v195_v7, %v193_v30  ;;  %v213_v30 = vld [vmem:[%s4323_s1 + $0x580] sm:$0xff]  ;;  %v215_v7 = vld [vmem:[%s4323_s1 + $0x590] sm:$0xff] }
  0x8e   :  { %2096 = vmatpush1.bf16.msra.mxu0 %v2095_v16  ;;  %1906 = vmatprep.subr.bf16.mxu1 %v1905_v17  ;;  %v2115_v16 = vpack.c.bf16 %v387_v48, %v385_v8  ;;  %v1925_v17 = vpack.c.bf16 %v200_v12, %v198_v10  ;;  %v405_v8 = vld [vmem:[%s4323_s1 + $0xb80] sm:$0xff]  ;;  %v407_v48 = vld [vmem:[%s4323_s1 + $0xb90] sm:$0xff]  ;;  %v218_v10 = vld [vmem:[%s4323_s1 + $0x5a8] sm:$0xff] }
  0x8f   :  { %2098 = vmatprep.subr.bf16.mxu0 %v2097_v21  ;;  %v2117_v21 = vpack.c.bf16 %v392_v14, %v390_v13  ;;  %v220_v12 = vld [vmem:[%s4323_s1 + $0x5b8] sm:$0xff]  ;;  %v410_v13 = vld [vmem:[%s4323_s1 + $0xba8] sm:$0xff] }
  0x90   :  { %v412_v14 = vld [vmem:[%s4323_s1 + $0xbb8] sm:$0xff] }
  0x91   :  { %1908 = vmatpush1.bf16.msra.mxu1 %v1907_v29  ;;  %v1927_v29 = vpack.c.bf16 %v199_v19, %v197_v18  ;;  %v217_v18 = vld [vmem:[%s4323_s1 + $0x5a0] sm:$0xff]  ;;  %v219_v19 = vld [vmem:[%s4323_s1 + $0x5b0] sm:$0xff] }
  0x92   :  { %2100 = vmatpush1.bf16.msra.mxu0 %v2099_v31  ;;  %1910 = vmatprep.subr.bf16.mxu1 %v1909_v32  ;;  %v2119_v31 = vpack.c.bf16 %v391_v22, %v389_v20  ;;  %v1929_v32 = vpack.c.bf16 %v204_v24, %v202_v23  ;;  %v409_v20 = vld [vmem:[%s4323_s1 + $0xba0] sm:$0xff]  ;;  %v411_v22 = vld [vmem:[%s4323_s1 + $0xbb0] sm:$0xff]  ;;  %v222_v23 = vld [vmem:[%s4323_s1 + $0x5c8] sm:$0xff] }
  0x93   :  { %2102 = vmatprep.subr.bf16.mxu0 %v2101_v36  ;;  %v2121_v36 = vpack.c.bf16 %v396_v28, %v394_v27  ;;  %v224_v24 = vld [vmem:[%s4323_s1 + $0x5d8] sm:$0xff]  ;;  %v414_v27 = vld [vmem:[%s4323_s1 + $0xbc8] sm:$0xff] }
  0x94   :  { %v416_v28 = vld [vmem:[%s4323_s1 + $0xbd8] sm:$0xff] }
  0x95   :  { %1912 = vmatpush1.bf16.msra.mxu1 %v1911_v43  ;;  %v1931_v43 = vpack.c.bf16 %v203_v34, %v201_v33  ;;  %v221_v33 = vld [vmem:[%s4323_s1 + $0x5c0] sm:$0xff]  ;;  %v223_v34 = vld [vmem:[%s4323_s1 + $0x5d0] sm:$0xff] }
  0x96   :  { %2104 = vmatpush1.bf16.msra.mxu0 %v2103_v44  ;;  %1914 = vmatprep.subr.bf16.mxu1 %v1913_v46  ;;  %v2123_v44 = vpack.c.bf16 %v395_v37, %v393_v35  ;;  %v1933_v46 = vpack.c.bf16 %v208_v40, %v206_v38  ;;  %v413_v35 = vld [vmem:[%s4323_s1 + $0xbc0] sm:$0xff]  ;;  %v415_v37 = vld [vmem:[%s4323_s1 + $0xbd0] sm:$0xff]  ;;  %v226_v38 = vld [vmem:[%s4323_s1 + $0x5e8] sm:$0xff] }
  0x97   :  { %2106 = vmatprep.subr.bf16.mxu0 %v2105_v25  ;;  %v2125_v25 = vpack.c.bf16 %v400_v42, %v398_v41  ;;  %v228_v40 = vld [vmem:[%s4323_s1 + $0x5f8] sm:$0xff]  ;;  %v418_v41 = vld [vmem:[%s4323_s1 + $0xbe8] sm:$0xff] }
  0x98   :  { %v420_v42 = vld [vmem:[%s4323_s1 + $0xbf8] sm:$0xff] }
  0x99   :  { %1916 = vmatpush1.bf16.msra.mxu1 %v1915_v56  ;;  %v1935_v56 = vpack.c.bf16 %v207_v45, %v205_v47  ;;  %v1953_v47 = vpack.c.bf16 %v228_v40, %v226_v38  ;;  %v227_v45 = vld [vmem:[%s4323_s1 + $0x5f0] sm:$0xff] }
  0x9a   :  { %2108 = vmatpush1.bf16.msra.mxu0 %v2107_v26  ;;  %1918 = vmatprep.subr.bf16.mxu1 %v1917_v57  ;;  %v2127_v26 = vpack.c.bf16 %v399_v50, %v397_v49  ;;  %v1937_v57 = vpack.c.bf16 %v212_v39, %v210_v52  ;;  %v417_v49 = vld [vmem:[%s4323_s1 + $0xbe0] sm:$0xff]  ;;  %v2145_v50 = vpack.c.bf16 %v420_v42, %v418_v41  ;;  %v3669_v52 = vld [vmem:[%s4324_s0 + $0x18] sm:$0xff]  ;;  %v550_v39 = vld [vmem:[%s4323_s1 + $0x1008] sm:$0xff] }
  0x9b   :  { %2110 = vmatprep.subr.bf16.mxu0 %v2109_v62  ;;  %v2129_v62 = vpack.c.bf16 %v404_v55, %v402_v54  ;;  %v552_v54 = vld [vmem:[%s4323_s1 + $0x1018] sm:$0xff]  ;;  %v422_v55 = vld [vmem:[%s4323_s1 + $0xc08] sm:$0xff]  ;;  %v435_v40 = vld [vmem:[%s4323_s1 + $0xc70] sm:$0xff] }
  0x9c   :  { %v566_v41 = vld [vmem:[%s4323_s1 + $0x1088] sm:$0xff]  ;;  %v568_v42 = vld [vmem:[%s4323_s1 + $0x1098] sm:$0xff] }
  0x9d   :  { %1920 = vmatpush1.bf16.msra.mxu1 %v1919_v4  ;;  %v1939_v4 = vpack.c.bf16 %v211_v59, %v209_v58  ;;  %v3685_v58 = vrot.slane %v3669_v52, %v2730_v11  ;;  %v2277_v59 = vpack.c.bf16 %v552_v54, %v550_v39  ;;  %v439_v54 = vld [vmem:[%s4323_s1 + $0xc90] sm:$0xff] }
  0x9e   :  { %2112 = vmatpush1.bf16.msra.mxu0 %v2111_v5  ;;  %1922 = vmatprep.subr.bf16.mxu1 %v1921_v6  ;;  %v2131_v5 = vpack.c.bf16 %v403_v63, %v401_v60  ;;  %v1941_v6 = vpack.c.bf16 %v216_v1, %v214_v0  ;;  %v549_v60 = vld [vmem:[%s4323_s1 + $0x1000] sm:$0xff]  ;;  %v423_v1 = vld [vmem:[%s4323_s1 + $0xc10] sm:$0xff] }
  0x9f   :  { %2114 = vmatprep.subr.bf16.mxu0 %v2113_v9  ;;  %v2133_v9 = vpack.c.bf16 %v408_v3, %v406_v2  ;;  %v421_v0 = vld [vmem:[%s4323_s1 + $0xc00] sm:$0xff]  ;;  %v426_v2 = vld [vmem:[%s4323_s1 + $0xc28] sm:$0xff]  ;;  %v428_v3 = vld [vmem:[%s4323_s1 + $0xc38] sm:$0xff] }
  0xa1   :  { %1924 = vmatpush1.bf16.msra.mxu1 %v1923_v15  ;;  %v1943_v15 = vpack.c.bf16 %v215_v7, %v213_v30  ;;  %v2151_v30 = vpack.c.bf16 %v423_v1, %v421_v0  ;;  %v425_v7 = vld [vmem:[%s4323_s1 + $0xc20] sm:$0xff]  ;;  %v571_v1 = vld [vmem:[%s4323_s1 + $0x10b0] sm:$0xff] }
  0xa2   :  { %2116 = vmatpush1.bf16.msra.mxu0 %v2115_v16  ;;  %1926 = vmatprep.subr.bf16.mxu1 %v1925_v17  ;;  %v2135_v16 = vpack.c.bf16 %v407_v48, %v405_v8  ;;  %v1945_v17 = vpack.c.bf16 %v220_v12, %v218_v10  ;;  %v664_v8 = vcombine.high %v3685_v58, %v3685_v58  ;;  %v555_v48 = vld [vmem:[%s4323_s1 + $0x1030] sm:$0xff]  ;;  %v569_v0 = vld [vmem:[%s4323_s1 + $0x10a0] sm:$0xff] }
  0xa3   :  { %2118 = vmatprep.subr.bf16.mxu0 %v2117_v21  ;;  %v2137_v21 = vpack.c.bf16 %v412_v14, %v410_v13  ;;  %v2153_v10 = vpack.c.bf16 %v428_v3, %v426_v2  ;;  %v427_v12 = vld [vmem:[%s4323_s1 + $0xc30] sm:$0xff]  ;;  %v558_v14 = vld [vmem:[%s4323_s1 + $0x1048] sm:$0xff] }
  0xa4   :  { %v443_v3 = vld [vmem:[%s4323_s1 + $0xcb0] sm:$0xff] }
  0xa5   :  { %1928 = vmatpush1.bf16.msra.mxu1 %v1927_v29  ;;  %v1947_v29 = vpack.c.bf16 %v219_v19, %v217_v18  ;;  %v2155_v19 = vpack.c.bf16 %v427_v12, %v425_v7  ;;  %v2299_v7 = vpack.c.bf16 %v571_v1, %v569_v0  ;;  %v575_v12 = vld [vmem:[%s4323_s1 + $0x10d0] sm:$0xff]  ;;  %v474_v1 = vld [vmem:[%s4323_s1 + $0xda8] sm:$0xff] }
  0xa6   :  { %2120 = vmatpush1.bf16.msra.mxu0 %v2119_v31  ;;  %1930 = vmatprep.subr.bf16.mxu1 %v1929_v32  ;;  %v2139_v31 = vpack.c.bf16 %v411_v22, %v409_v20  ;;  %v1949_v32 = vpack.c.bf16 %v224_v24, %v222_v23  ;;  %v429_v20 = vld [vmem:[%s4323_s1 + $0xc40] sm:$0xff]  ;;  %v559_v22 = vld [vmem:[%s4323_s1 + $0x1050] sm:$0xff]  ;;  %v562_v24 = vld [vmem:[%s4323_s1 + $0x1068] sm:$0xff] }
  0xa7   :  { %2122 = vmatprep.subr.bf16.mxu0 %v2121_v36  ;;  %v2141_v36 = vpack.c.bf16 %v416_v28, %v414_v27  ;;  %v431_v23 = vld [vmem:[%s4323_s1 + $0xc50] sm:$0xff]  ;;  %v564_v27 = vld [vmem:[%s4323_s1 + $0x1078] sm:$0xff]  ;;  %v434_v28 = vld [vmem:[%s4323_s1 + $0xc68] sm:$0xff] }
  0xa8   :  { %v471_v0 = vld [vmem:[%s4323_s1 + $0xd90] sm:$0xff] }
  0xa9   :  { %1932 = vmatpush1.bf16.msra.mxu1 %v1931_v43  ;;  %v1951_v43 = vpack.c.bf16 %v223_v34, %v221_v33  ;;  %v2159_v33 = vpack.c.bf16 %v431_v23, %v429_v20  ;;  %v433_v34 = vld [vmem:[%s4323_s1 + $0xc60] sm:$0xff] }
  0xaa   :  { %2124 = vmatpush1.bf16.msra.mxu0 %v2123_v44  ;;  %1934 = vmatprep.subr.bf16.mxu1 %v1933_v46  ;;  %v225_v44 = vld [vmem:[%s4323_s1 + $0x5e0] sm:$0xff]  ;;  %v2143_v46 = vpack.c.bf16 %v415_v37, %v413_v35  ;;  %v2289_v35 = vpack.c.bf16 %v564_v27, %v562_v24  ;;  %v563_v37 = vld [vmem:[%s4323_s1 + $0x1070] sm:$0xff]  ;;  %v454_v27 = vld [vmem:[%s4323_s1 + $0xd08] sm:$0xff] }
  0xab   :  { %2126 = vmatprep.subr.bf16.mxu0 %v2125_v25  ;;  %v419_v25 = vld [vmem:[%s4323_s1 + $0xbf0] sm:$0xff]  ;;  %v449_v23 = vld [vmem:[%s4323_s1 + $0xce0] sm:$0xff] }
  0xac   :  { %v451_v24 = vld [vmem:[%s4323_s1 + $0xcf0] sm:$0xff] }
  0xad   :  { %1936 = vmatpush1.bf16.msra.mxu1 %v1935_v56  ;;  %v424_v56 = vld [vmem:[%s4323_s1 + $0xc18] sm:$0xff] }
  0xae   :  { %2128 = vmatpush1.bf16.msra.mxu0 %v2127_v26  ;;  %1938 = vmatprep.subr.bf16.mxu1 %v1937_v57  ;;  %v1955_v26 = vpack.c.bf16 %v227_v45, %v225_v44  ;;  %v2147_v57 = vpack.c.bf16 %v419_v25, %v417_v49  ;;  %v2149_v63 = vpack.c.bf16 %v424_v56, %v422_v55  ;;  %v440_v44 = vld [vmem:[%s4323_s1 + $0xc98] sm:$0xff]  ;;  %v437_v45 = vld [vmem:[%s4323_s1 + $0xc80] sm:$0xff]  ;;  %v570_v55 = vld [vmem:[%s4323_s1 + $0x10a8] sm:$0xff] }
  0xaf   :  { %2130 = vmatprep.subr.bf16.mxu0 %v2129_v62  ;;  %v551_v62 = vld [vmem:[%s4323_s1 + $0x1010] sm:$0xff]  ;;  %v2293_v49 = vpack.c.bf16 %v568_v42, %v566_v41  ;;  %v565_v25 = vld [vmem:[%s4323_s1 + $0x1080] sm:$0xff]  ;;  %v572_v56 = vld [vmem:[%s4323_s1 + $0x10b8] sm:$0xff] }
  0xb0   :  { %v457_v42 = vld [vmem:[%s4323_s1 + $0xd20] sm:$0xff] }
  0xb1   :  { %1940 = vmatpush1.bf16.msra.mxu1 %v1939_v4  ;;  %v554_v4 = vld [vmem:[%s4323_s1 + $0x1028] sm:$0xff] }
  0xb2   :  { %2132 = vmatpush1.bf16.msra.mxu0 %v2131_v5  ;;  %1942 = vmatprep.subr.bf16.mxu1 %v1941_v6  ;;  %v556_v5 = vld [vmem:[%s4323_s1 + $0x1038] sm:$0xff]  ;;  %v2279_v6 = vpack.c.bf16 %v551_v62, %v549_v60  ;;  %v2167_v60 = vpack.c.bf16 %v439_v54, %v437_v45  ;;  %v441_v62 = vld [vmem:[%s4323_s1 + $0xca0] sm:$0xff] }
  0xb3   :  { %2134 = vmatprep.subr.bf16.mxu0 %v2133_v9  ;;  %v553_v9 = vld [vmem:[%s4323_s1 + $0x1020] sm:$0xff]  ;;  %v2281_v13 = vpack.c.bf16 %v556_v5, %v554_v4  ;;  %v574_v4 = vld [vmem:[%s4323_s1 + $0x10c8] sm:$0xff]  ;;  %v576_v5 = vld [vmem:[%s4323_s1 + $0x10d8] sm:$0xff] }
  0xb4   :  { %v2283_v18 = vpack.c.bf16 %v555_v48, %v553_v9  ;;  %v445_v9 = vld [vmem:[%s4323_s1 + $0xcc0] sm:$0xff]  ;;  %v2301_v48 = vpack.c.bf16 %v576_v5, %v574_v4 }
  0xb5   :  { %1944 = vmatpush1.bf16.msra.mxu1 %v1943_v15  ;;  %v560_v15 = vld [vmem:[%s4323_s1 + $0x1058] sm:$0xff]  ;;  %v473_v5 = vld [vmem:[%s4323_s1 + $0xda0] sm:$0xff] }
  0xb6   :  { %2136 = vmatpush1.bf16.msra.mxu0 %v2135_v16  ;;  %1946 = vmatprep.subr.bf16.mxu1 %v1945_v17  ;;  %v430_v16 = vld [vmem:[%s4323_s1 + $0xc48] sm:$0xff]  ;;  %v432_v17 = vld [vmem:[%s4323_s1 + $0xc58] sm:$0xff] }
  0xb7   :  { %2138 = vmatprep.subr.bf16.mxu0 %v2137_v21  ;;  %v557_v21 = vld [vmem:[%s4323_s1 + $0x1040] sm:$0xff] }
  0xb9   :  { %1948 = vmatpush1.bf16.msra.mxu1 %v1947_v29  ;;  %v436_v29 = vld [vmem:[%s4323_s1 + $0xc78] sm:$0xff] }
  0xba   :  { %2140 = vmatpush1.bf16.msra.mxu0 %v2139_v31  ;;  %1950 = vmatprep.subr.bf16.mxu1 %v1949_v32  ;;  %v2396_v31 = vmov 0.0   ;;  %v2287_v32 = vpack.c.bf16 %v559_v22, %v557_v21  ;;  %v2161_v38 = vpack.c.bf16 %v436_v29, %v434_v28  ;;  %v577_v21 = vld [vmem:[%s4323_s1 + $0x10e0] sm:$0xff]  ;;  %v579_v22 = vld [vmem:[%s4323_s1 + $0x10f0] sm:$0xff]  ;;  %v456_v28 = vld [vmem:[%s4323_s1 + $0xd18] sm:$0xff] }
  0xbb   :  { %2142 = vmatprep.subr.bf16.mxu0 %v2141_v36  ;;  %v561_v36 = vld [vmem:[%s4323_s1 + $0x1060] sm:$0xff]  ;;  %v2307_v29 = vpack.c.bf16 %v579_v22, %v577_v21 }
  0xbc   :  { %v485_v22 = vld [vmem:[%s4323_s1 + $0xe00] sm:$0xff] }
  0xbd   :  { %1952 = vmatpush1.bf16.msra.mxu1 %v1951_v43  ;;  %v438_v43 = vld [vmem:[%s4323_s1 + $0xc88] sm:$0xff] }
  0xbe   :  { %2144 = vmatpush1.bf16.msra.mxu0 %v2143_v46  ;;  %1954 = vmatprep.subr.bf16.mxu1 %v1953_v47  ;;  %v2291_v46 = vpack.c.bf16 %v563_v37, %v561_v36  ;;  %v2163_v47 = vpack.c.bf16 %v435_v40, %v433_v34  ;;  %v2165_v39 = vpack.c.bf16 %v440_v44, %v438_v43  ;;  %v453_v34 = vld [vmem:[%s4323_s1 + $0xd00] sm:$0xff]  ;;  %v458_v36 = vld [vmem:[%s4323_s1 + $0xd28] sm:$0xff]  ;;  %v460_v37 = vld [vmem:[%s4323_s1 + $0xd38] sm:$0xff] }
  0xbf   :  { %2146 = vmatprep.subr.bf16.mxu0 %v2145_v50  ;;  %v567_v50 = vld [vmem:[%s4323_s1 + $0x1090] sm:$0xff]  ;;  %v2185_v41 = vpack.c.bf16 %v460_v37, %v458_v36  ;;  %v462_v44 = vld [vmem:[%s4323_s1 + $0xd48] sm:$0xff]  ;;  %v493_v37 = vld [vmem:[%s4323_s1 + $0xe40] sm:$0xff] }
  0xc0   :  { %v459_v43 = vld [vmem:[%s4323_s1 + $0xd30] sm:$0xff] }
  0xc1   :  { %1956 = vmatpush1.bf16.msra.mxu1 %v1955_v26  ;;  %v442_v26 = vld [vmem:[%s4323_s1 + $0xca8] sm:$0xff] }
  0xc2   :  { %2148 = vmatpush1.bf16.msra.mxu0 %v2147_v57  ;;  %2278 = vmatprep.subr.bf16.mxu1 %v2277_v59  ;;  %v444_v57 = vld [vmem:[%s4323_s1 + $0xcb8] sm:$0xff]  ;;  %v2295_v59 = vpack.c.bf16 %v567_v50, %v565_v25  ;;  %v463_v25 = vld [vmem:[%s4323_s1 + $0xd50] sm:$0xff]  ;;  %v466_v50 = vld [vmem:[%s4323_s1 + $0xd68] sm:$0xff] }
  0xc3   :  { %2150 = vmatprep.subr.bf16.mxu0 %v2149_v63  ;;  %v2297_v63 = vpack.c.bf16 %v572_v56, %v570_v55  ;;  %v2169_v2 = vpack.c.bf16 %v444_v57, %v442_v26  ;;  %v465_v56 = vld [vmem:[%s4323_s1 + $0xd60] sm:$0xff]  ;;  %v467_v26 = vld [vmem:[%s4323_s1 + $0xd70] sm:$0xff]  ;;  %v470_v57 = vld [vmem:[%s4323_s1 + $0xd88] sm:$0xff] }
  0xc4   :  { %897 = vmatmul.mubr.f32.vlgmr.msra.gmra.mrb[0].mxu1 %v3301_v51  ;;  %v2285_v51 = vpack.c.bf16 %v560_v15, %v558_v14  ;;  %v447_v14 = vld [vmem:[%s4323_s1 + $0xcd0] sm:$0xff]  ;;  %v578_v15 = vld [vmem:[%s4323_s1 + $0x10e8] sm:$0xff] }
  0xc5   :  { %1110 = vmatmul.mubr.f32.vlgmr.msra.gmra.mrb[0].mxu0 %v3310_v53  ;;  %2280 = vmatpush1.bf16.msra.mxu1 %v2279_v6  ;;  %v2157_v53 = vpack.c.bf16 %v432_v17, %v430_v16  ;;  %v446_v6 = vld [vmem:[%s4323_s1 + $0xcc8] sm:$0xff]  ;;  %v580_v16 = vld [vmem:[%s4323_s1 + $0x10f8] sm:$0xff]  ;;  %v2175_v20 = vpack.c.bf16 %v447_v14, %v445_v9 }
  0xc6   :  { %2152 = vmatpush1.bf16.msra.mxu0 %v2151_v30  ;;  %1180 = vmatprep.mubr.f32.mxu0 %v664_v8  ;;  %v448_v30 = vld [vmem:[%s4323_s1 + $0xcd8] sm:$0xff]  ;;  %v2171_v8 = vpack.c.bf16 %v443_v3, %v441_v62  ;;  %v450_v17 = vld [vmem:[%s4323_s1 + $0xce8] sm:$0xff] }
  0xc7   :  { %2154 = vmatprep.subr.bf16.mxu0 %v2153_v10  ;;  %2282 = vmatprep.subr.bf16.mxu1 %v2281_v13  ;;  %v573_v10 = vld [vmem:[%s4323_s1 + $0x10c0] sm:$0xff]  ;;  %v2173_v13 = vpack.c.bf16 %v448_v30, %v446_v6  ;;  %v475_v6 = vld [vmem:[%s4323_s1 + $0xdb0] sm:$0xff]  ;;  %v478_v30 = vld [vmem:[%s4323_s1 + $0xdc8] sm:$0xff] }
  0xc8   :  { %1322 = vmatprep.mubr.f32.mxu1 %v2396_v31 }
  0xc9   :  { %2284 = vmatpush1.bf16.msra.mxu1 %v2283_v18  ;;  %v452_v18 = vld [vmem:[%s4323_s1 + $0xcf8] sm:$0xff] }
  0xca   :  { %2156 = vmatpush1.bf16.msra.mxu0 %v2155_v19  ;;  %2286 = vmatprep.subr.bf16.mxu1 %v2285_v51  ;;  %v2303_v19 = vpack.c.bf16 %v575_v12, %v573_v10  ;;  %v2305_v51 = vpack.c.bf16 %v580_v16, %v578_v15  ;;  %v479_v10 = vld [vmem:[%s4323_s1 + $0xdd0] sm:$0xff]  ;;  %v482_v12 = vld [vmem:[%s4323_s1 + $0xde8] sm:$0xff]  ;;  %v649_v15 = vcombine.high %v3669_v52, %v3669_v52 }
  0xcb   :  { %2158 = vmatprep.subr.bf16.mxu0 %v2157_v53  ;;  %v2177_v53 = vpack.c.bf16 %v452_v18, %v450_v17  ;;  %v481_v17 = vld [vmem:[%s4323_s1 + $0xde0] sm:$0xff]  ;;  %v483_v18 = vld [vmem:[%s4323_s1 + $0xdf0] sm:$0xff] }
  0xcc   :  { %v2211_v52 = vpack.c.bf16 %v483_v18, %v481_v17  ;;  %v1336_v17 = vld [vmem:[%s4325_s3 + $0x20] sm:$0xff]  ;;  %v1337_v18 = vld [vmem:[%s4325_s3 + $0x28] sm:$0xff] }
  0xcd   :  { %2288 = vmatpush1.bf16.msra.mxu1 %v2287_v32  ;;  %v2179_v32 = vpack.c.bf16 %v451_v24, %v449_v23  ;;  %v490_v23 = vld [vmem:[%s4323_s1 + $0xe28] sm:$0xff]  ;;  %v492_v24 = vld [vmem:[%s4323_s1 + $0xe38] sm:$0xff] }
  0xce   :  { %2160 = vmatpush1.bf16.msra.mxu0 %v2159_v33  ;;  %2290 = vmatprep.subr.bf16.mxu1 %v2289_v35  ;;  %v2181_v33 = vpack.c.bf16 %v456_v28, %v454_v27  ;;  %v455_v35 = vld [vmem:[%s4323_s1 + $0xd10] sm:$0xff]  ;;  %v2217_v28 = vpack.c.bf16 %v492_v24, %v490_v23 }
  0xcf   :  { %2162 = vmatprep.subr.bf16.mxu0 %v2161_v38  ;;  %v1640_v38 = vld.sshfl [vmem:[%s4324_s0 + $0x20] sm:$0x3 pattern:$0x76325410]  ;;  %v2183_v40 = vpack.c.bf16 %v455_v35, %v453_v34  ;;  %v496_v34 = vld [vmem:[%s4323_s1 + $0xe58] sm:$0xff]  ;;  %v1338_v24 = vld [vmem:[%s4325_s3 + $0x30] sm:$0xff] }
  0xd1   :  { %2292 = vmatpush1.bf16.msra.mxu1 %v2291_v46  ;;  %v464_v46 = vld [vmem:[%s4323_s1 + $0xd58] sm:$0xff] }
  0xd2   :  { %2164 = vmatpush1.bf16.msra.mxu0 %v2163_v47  ;;  %2294 = vmatprep.subr.bf16.mxu1 %v2293_v49  ;;  %v2187_v47 = vpack.c.bf16 %v459_v43, %v457_v42  ;;  %v2189_v45 = vpack.c.bf16 %v464_v46, %v462_v44  ;;  %v461_v49 = vld [vmem:[%s4323_s1 + $0xd40] sm:$0xff]  ;;  %v499_v44 = vld [vmem:[%s4323_s1 + $0xe70] sm:$0xff]  ;;  %v502_v46 = vld [vmem:[%s4323_s1 + $0xe88] sm:$0xff] }
  0xd3   :  { %2166 = vmatprep.subr.bf16.mxu0 %v2165_v39  ;;  %v468_v39 = vld [vmem:[%s4323_s1 + $0xd78] sm:$0xff]  ;;  %v2191_v54 = vpack.c.bf16 %v463_v25, %v461_v49  ;;  %v497_v43 = vld [vmem:[%s4323_s1 + $0xe60] sm:$0xff] }
  0xd4   :  { %v2193_v55 = vpack.c.bf16 %v468_v39, %v466_v50  ;;  %v501_v25 = vld [vmem:[%s4323_s1 + $0xe80] sm:$0xff]  ;;  %v503_v50 = vld [vmem:[%s4323_s1 + $0xe90] sm:$0xff]  ;;  %v506_v39 = vld [vmem:[%s4323_s1 + $0xea8] sm:$0xff] }
  0xd5   :  { %2296 = vmatpush1.bf16.msra.mxu1 %v2295_v59  ;;  %v472_v59 = vld [vmem:[%s4323_s1 + $0xd98] sm:$0xff] }
  0xd6   :  { %2168 = vmatpush1.bf16.msra.mxu0 %v2167_v60  ;;  %2298 = vmatprep.subr.bf16.mxu1 %v2297_v63  ;;  %v2195_v60 = vpack.c.bf16 %v467_v26, %v465_v56  ;;  %v2197_v62 = vpack.c.bf16 %v472_v59, %v470_v57  ;;  %v469_v63 = vld [vmem:[%s4323_s1 + $0xd80] sm:$0xff]  ;;  %v507_v57 = vld [vmem:[%s4323_s1 + $0xeb0] sm:$0xff]  ;;  %v510_v59 = vld [vmem:[%s4323_s1 + $0xec8] sm:$0xff] }
  0xd7   :  { %2170 = vmatprep.subr.bf16.mxu0 %v2169_v2  ;;  %v476_v2 = vld [vmem:[%s4323_s1 + $0xdb8] sm:$0xff]  ;;  %v2199_v3 = vpack.c.bf16 %v471_v0, %v469_v63  ;;  %v505_v26 = vld [vmem:[%s4323_s1 + $0xea0] sm:$0xff] }
  0xd8   :  { %v2201_v4 = vpack.c.bf16 %v476_v2, %v474_v1  ;;  %v509_v0 = vld [vmem:[%s4323_s1 + $0xec0] sm:$0xff]  ;;  %v511_v1 = vld [vmem:[%s4323_s1 + $0xed0] sm:$0xff]  ;;  %v514_v2 = vld [vmem:[%s4323_s1 + $0xee8] sm:$0xff] }
  0xd9   :  { %2300 = vmatpush1.bf16.msra.mxu1 %v2299_v7  ;;  %v480_v7 = vld [vmem:[%s4323_s1 + $0xdd8] sm:$0xff] }
  0xda   :  { %2172 = vmatpush1.bf16.msra.mxu0 %v2171_v8  ;;  %2302 = vmatprep.subr.bf16.mxu1 %v2301_v48  ;;  %v2203_v8 = vpack.c.bf16 %v475_v6, %v473_v5  ;;  %v2205_v9 = vpack.c.bf16 %v480_v7, %v478_v30  ;;  %v477_v48 = vld [vmem:[%s4323_s1 + $0xdc0] sm:$0xff]  ;;  %v2397_v5 = vmov 0.0|0.0   ;;  %v1333_v30 = vld [vmem:[%s4325_s3 + $0x8] sm:$0xff]  ;;  %v1334_v7 = vld [vmem:[%s4325_s3 + $0x10] sm:$0xff] }
  0xdb   :  { %2174 = vmatprep.subr.bf16.mxu0 %v2173_v13  ;;  %v484_v13 = vld [vmem:[%s4323_s1 + $0xdf8] sm:$0xff]  ;;  %v2207_v14 = vpack.c.bf16 %v479_v10, %v477_v48  ;;  %v1332_v6 = vld [vmem:[%s4325_s3] sm:$0xff]  ;;  %v515_v48 = vld [vmem:[%s4323_s1 + $0xef0] sm:$0xff] }
  0xdc   :  { %v2209_v16 = vpack.c.bf16 %v484_v13, %v482_v12  ;;  %v2310_v10 = vpack.c.bf16 %v1333_v30, %v1332_v6  ;;  %v1335_v12 = vld [vmem:[%s4325_s3 + $0x18] sm:$0xff]  ;;  %v518_v13 = vld [vmem:[%s4323_s1 + $0xf08] sm:$0xff]  ;;  %v541_v30 = vld [vmem:[%s4323_s1 + $0xfc0] sm:$0xff] }
  0xdd   :  { %2304 = vmatpush1.bf16.msra.mxu1 %v2303_v19  ;;  %v486_v19 = vld [vmem:[%s4323_s1 + $0xe08] sm:$0xff] }
  0xde   :  { %2176 = vmatpush1.bf16.msra.mxu0 %v2175_v20  ;;  %2306 = vmatprep.subr.bf16.mxu1 %v2305_v51  ;;  %v488_v20 = vld [vmem:[%s4323_s1 + $0xe18] sm:$0xff]  ;;  %v3980_v51 = vrot.slane %v649_v15, %v2730_v11  ;;  %v2313_v15 = vpack.c.bf16 %v1335_v12, %v1334_v7  ;;  %v543_v7 = vld [vmem:[%s4323_s1 + $0xfd0] sm:$0xff]  ;;  %v545_v12 = vld [vmem:[%s4323_s1 + $0xfe0] sm:$0xff] }
  0xdf   :  { %2178 = vmatprep.subr.bf16.mxu0 %v2177_v53  ;;  %v2213_v21 = vpack.c.bf16 %v488_v20, %v486_v19  ;;  %v487_v53 = vld [vmem:[%s4323_s1 + $0xe10] sm:$0xff]  ;;  %v517_v20 = vld [vmem:[%s4323_s1 + $0xf00] sm:$0xff] }
  0xe0   :  { %v2215_v11 = vpack.c.bf16 %v487_v53, %v485_v22  ;;  %v665_v27 = vcombine.high %v3980_v51, %v3980_v51  ;;  %v524_v22 = vld [vmem:[%s4323_s1 + $0xf38] sm:$0xff]  ;;  %v2316_v53 = vpack.c.bf16 %v1337_v18, %v1336_v17  ;;  %v1344_v17 = vld [vmem:[%s4325_s3 + $0x60] sm:$0xff]  ;;  %v1345_v18 = vld [vmem:[%s4325_s3 + $0x68] sm:$0xff] }
  0xe1   :  { %2308 = vmatpush1.bf16.msra.mxu1 %v2307_v29  ;;  %v489_v29 = vld [vmem:[%s4323_s1 + $0xe20] sm:$0xff] }
  0xe2   :  { %2180 = vmatpush1.bf16.msra.mxu0 %v2179_v32  ;;  %v491_v32 = vld [vmem:[%s4323_s1 + $0xe30] sm:$0xff]  ;;  %2309 = vmatprep.subr.bf16.mxu1 %v2397_v5 }
  0xe3   :  { %2182 = vmatprep.subr.bf16.mxu0 %v2181_v33  ;;  %v494_v33 = vld [vmem:[%s4323_s1 + $0xe48] sm:$0xff]  ;;  %v2219_v35 = vpack.c.bf16 %v491_v32, %v489_v29  ;;  %v523_v29 = vld [vmem:[%s4323_s1 + $0xf30] sm:$0xff] }
  0xe4   :  { %1323 = vmatmul.mubr.f32.vlgmr.msra.gmra.mrb[2].mxu1 %v1640_v38  ;;  %v2221_v36 = vpack.c.bf16 %v496_v34, %v494_v33  ;;  %v495_v38 = vld [vmem:[%s4323_s1 + $0xe50] sm:$0xff]  ;;  %v526_v32 = vld [vmem:[%s4323_s1 + $0xf48] sm:$0xff]  ;;  %v528_v33 = vld [vmem:[%s4323_s1 + $0xf58] sm:$0xff] }
  0xe5   :  { %2311 = vmatpush3.bf16.msra.mxu1 %v2310_v10  ;;  %1716 = vmatprep.mubr.msk.f32.mxu1 %vm2398_vm0, %v2396_v31 }
  0xe6   :  { %2184 = vmatpush1.bf16.msra.mxu0 %v2183_v40  ;;  %v498_v40 = vld [vmem:[%s4323_s1 + $0xe68] sm:$0xff]  ;;  %2312 = vmatprep.subr.bf16.mxu1 %v2397_v5 }
  0xe7   :  { %2186 = vmatprep.subr.bf16.mxu0 %v2185_v41  ;;  %v2223_v41 = vpack.c.bf16 %v495_v38, %v493_v37  ;;  %v1341_v37 = vld [vmem:[%s4325_s3 + $0x48] sm:$0xff]  ;;  %v2253_v38 = vpack.c.bf16 %v528_v33, %v526_v32 }
  0xe9   :  { %2314 = vmatpush3.bf16.msra.mxu1 %v2313_v15 }
  0xea   :  { %2188 = vmatpush1.bf16.msra.mxu0 %v2187_v47  ;;  %v504_v47 = vld [vmem:[%s4323_s1 + $0xe98] sm:$0xff]  ;;  %2315 = vmatprep.subr.bf16.mxu1 %v2397_v5 }
  0xeb   :  { %2190 = vmatprep.subr.bf16.mxu0 %v2189_v45  ;;  %v2227_v45 = vpack.c.bf16 %v499_v44, %v497_v43  ;;  %v2229_v49 = vpack.c.bf16 %v504_v47, %v502_v46  ;;  %v1342_v46 = vld [vmem:[%s4325_s3 + $0x50] sm:$0xff]  ;;  %v1343_v47 = vld [vmem:[%s4325_s3 + $0x58] sm:$0xff] }
  0xed   :  { %2317 = vmatpush3.bf16.msra.mxu1 %v2316_v53  ;;  %v585_v53 = vsub.s32 0, %v2703_v61 }
  0xee   :  { %2192 = vmatpush1.bf16.msra.mxu0 %v2191_v54  ;;  %v508_v54 = vld [vmem:[%s4323_s1 + $0xeb8] sm:$0xff]  ;;  %2318 = vmatprep.subr.bf16.mxu1 %v2397_v5 }
  0xef   :  { %2194 = vmatprep.subr.bf16.mxu0 %v2193_v55  ;;  %v2231_v55 = vpack.c.bf16 %v503_v50, %v501_v25  ;;  %v2233_v56 = vpack.c.bf16 %v508_v54, %v506_v39  ;;  %v531_v25 = vld [vmem:[%s4323_s1 + $0xf70] sm:$0xff]  ;;  %v534_v50 = vld [vmem:[%s4323_s1 + $0xf88] sm:$0xff]  ;;  %v536_v39 = vld [vmem:[%s4323_s1 + $0xf98] sm:$0xff]  ;;  %v2325_v54 = vpack.c.bf16 %v1343_v47, %v1342_v46 }
  0xf0   :  { %v1430_v47 = vld [vmem:[%s4327_s5 + $0x20] sm:$0xff] }
  0xf2   :  { %2196 = vmatpush1.bf16.msra.mxu0 %v2195_v60  ;;  %v512_v60 = vld [vmem:[%s4323_s1 + $0xed8] sm:$0xff] }
  0xf3   :  { %2198 = vmatprep.subr.bf16.mxu0 %v2197_v62  ;;  %v2235_v62 = vpack.c.bf16 %v507_v57, %v505_v26  ;;  %v2237_v63 = vpack.c.bf16 %v512_v60, %v510_v59  ;;  %v533_v26 = vld [vmem:[%s4323_s1 + $0xf80] sm:$0xff]  ;;  %v535_v57 = vld [vmem:[%s4323_s1 + $0xf90] sm:$0xff]  ;;  %v538_v59 = vld [vmem:[%s4323_s1 + $0xfa8] sm:$0xff] }
  0xf4   :  { %v540_v60 = vld [vmem:[%s4323_s1 + $0xfb8] sm:$0xff] }
  0xf6   :  { %2200 = vmatpush1.bf16.msra.mxu0 %v2199_v3  ;;  %v516_v3 = vld [vmem:[%s4323_s1 + $0xef8] sm:$0xff] }
  0xf7   :  { %2202 = vmatprep.subr.bf16.mxu0 %v2201_v4  ;;  %v2239_v4 = vpack.c.bf16 %v511_v1, %v509_v0  ;;  %v537_v0 = vld [vmem:[%s4323_s1 + $0xfa0] sm:$0xff]  ;;  %v539_v1 = vld [vmem:[%s4323_s1 + $0xfb0] sm:$0xff] }
  0xfa   :  { %2204 = vmatpush1.bf16.msra.mxu0 %v2203_v8  ;;  %v2241_v8 = vpack.c.bf16 %v516_v3, %v514_v2  ;;  %v542_v2 = vld [vmem:[%s4323_s1 + $0xfc8] sm:$0xff]  ;;  %v544_v3 = vld [vmem:[%s4323_s1 + $0xfd8] sm:$0xff] }
  0xfb   :  { %2206 = vmatprep.subr.bf16.mxu0 %v2205_v9  ;;  %v513_v9 = vld [vmem:[%s4323_s1 + $0xee0] sm:$0xff]  ;;  %v2269_v6 = vpack.c.bf16 %v544_v3, %v542_v2 }
  0xfc   :  { %v1641_v3 = vld [vmem:[%s4328_s4] ss:$0 sm:$0xff] }
  0xfe   :  { %2208 = vmatpush1.bf16.msra.mxu0 %v2207_v14  ;;  %v520_v14 = vld [vmem:[%s4323_s1 + $0xf18] sm:$0xff] }
  0xff   :  { %2210 = vmatprep.subr.bf16.mxu0 %v2209_v16  ;;  %v2243_v16 = vpack.c.bf16 %v515_v48, %v513_v9  ;;  %v2245_v19 = vpack.c.bf16 %v520_v14, %v518_v13  ;;  %v548_v9 = vld [vmem:[%s4323_s1 + $0xff8] sm:$0xff]  ;;  %v2271_v48 = vpack.c.bf16 %v543_v7, %v541_v30  ;;  %v547_v13 = vld [vmem:[%s4323_s1 + $0xff0] sm:$0xff] }
 0x100   :  { %v2275_v14 = vpack.c.bf16 %v547_v13, %v545_v12  ;;  %v1523_v12 = vld [vmem:[%s4329_s7 + $0x18] sm:$0xff] }
 0x102   :  { %2212 = vmatpush1.bf16.msra.mxu0 %v2211_v52  ;;  %v519_v52 = vld [vmem:[%s4323_s1 + $0xf10] sm:$0xff] }
 0x103   :  { %2214 = vmatprep.subr.bf16.mxu0 %v2213_v21  ;;  %v522_v21 = vld [vmem:[%s4323_s1 + $0xf28] sm:$0xff]  ;;  %v2247_v23 = vpack.c.bf16 %v519_v52, %v517_v20  ;;  %v1346_v20 = vld [vmem:[%s4325_s3 + $0x70] sm:$0xff] }
 0x105   :  { %1181 = vmatmul.mubr.f32.vlgmr.msra.gmra.mrb[0].mxu0 %v3685_v58  ;;  %v500_v58 = vld [vmem:[%s4323_s1 + $0xe78] sm:$0xff] }
 0x106   :  { %2216 = vmatpush1.bf16.msra.mxu0 %v2215_v11  ;;  %1251 = vmatprep.mubr.f32.mxu0 %v665_v27  ;;  %v2225_v42 = vpack.c.bf16 %v500_v58, %v498_v40  ;;  %v1339_v11 = vld [vmem:[%s4325_s3 + $0x38] sm:$0xff]  ;;  %v2249_v27 = vpack.c.bf16 %v524_v22, %v522_v21  ;;  %v525_v40 = vld [vmem:[%s4323_s1 + $0xf40] sm:$0xff]  ;;  %v527_v58 = vld [vmem:[%s4323_s1 + $0xf50] sm:$0xff] }
 0x107   :  { %2218 = vmatprep.subr.bf16.mxu0 %v2217_v28  ;;  %v521_v28 = vld [vmem:[%s4323_s1 + $0xf20] sm:$0xff]  ;;  %v2319_v34 = vpack.c.bf16 %v1339_v11, %v1338_v24  ;;  %v2255_v44 = vpack.c.bf16 %v527_v58, %v525_v40  ;;  %v589_v24 = vsub.s32 1, %v2703_v61  ;;  %v1427_v40 = vld [vmem:[%s4327_s5 + $0x8] sm:$0xff] }
 0x109   :  { %2320 = vmatpush3.bf16.msra.mxu1 %v2319_v34 }
 0x10a   :  { %2220 = vmatpush1.bf16.msra.mxu0 %v2219_v35  ;;  %v2251_v35 = vpack.c.bf16 %v523_v29, %v521_v28  ;;  %2321 = vmatprep.subr.bf16.mxu1 %v2397_v5 }
 0x10b   :  { %2222 = vmatprep.subr.bf16.mxu0 %v2221_v36  ;;  %v1340_v36 = vld [vmem:[%s4325_s3 + $0x40] sm:$0xff] }
 0x10c   :  { %v2322_v43 = vpack.c.bf16 %v1341_v37, %v1340_v36 }
 0x10e   :  { %2224 = vmatpush1.bf16.msra.mxu0 %v2223_v41  ;;  %v530_v41 = vld [vmem:[%s4323_s1 + $0xf68] sm:$0xff]  ;;  %2323 = vmatpush3.bf16.msra.mxu1 %v2322_v43  ;;  %v1428_v43 = vld [vmem:[%s4327_s5 + $0x10] sm:$0xff] }
 0x10f   :  { %2226 = vmatprep.subr.bf16.mxu0 %v2225_v42  ;;  %v532_v42 = vld [vmem:[%s4323_s1 + $0xf78] sm:$0xff]  ;;  %2324 = vmatprep.subr.bf16.mxu1 %v2397_v5 }
 0x112   :  { %2228 = vmatpush1.bf16.msra.mxu0 %v2227_v45  ;;  %v2257_v45 = vpack.c.bf16 %v532_v42, %v530_v41  ;;  %2326 = vmatpush3.bf16.msra.mxu1 %v2325_v54  ;;  %v1434_v54 = vld [vmem:[%s4327_s5 + $0x40] sm:$0xff] }
 0x113   :  { %2230 = vmatprep.subr.bf16.mxu0 %v2229_v49  ;;  %v529_v49 = vld [vmem:[%s4323_s1 + $0xf60] sm:$0xff]  ;;  %2327 = vmatprep.subr.bf16.mxu1 %v2397_v5 }
 0x116   :  { %2232 = vmatpush1.bf16.msra.mxu0 %v2231_v55  ;;  %v2259_v55 = vpack.c.bf16 %v531_v25, %v529_v49  ;;  %v1432_v25 = vld [vmem:[%s4327_s5 + $0x30] sm:$0xff] }
 0x117   :  { %2234 = vmatprep.subr.bf16.mxu0 %v2233_v56  ;;  %v2261_v56 = vpack.c.bf16 %v536_v39, %v534_v50  ;;  %v1433_v50 = vld [vmem:[%s4327_s5 + $0x38] sm:$0xff] }
 0x118   :  { %v2343_v39 = vpack.c.bf16 %v1433_v50, %v1432_v25 }
 0x11a   :  { %2236 = vmatpush1.bf16.msra.mxu0 %v2235_v62  ;;  %v2263_v62 = vpack.c.bf16 %v535_v57, %v533_v26  ;;  %v1436_v26 = vld [vmem:[%s4327_s5 + $0x50] sm:$0xff]  ;;  %v1437_v57 = vld [vmem:[%s4327_s5 + $0x58] sm:$0xff] }
 0x11b   :  { %2238 = vmatprep.subr.bf16.mxu0 %v2237_v63  ;;  %v2265_v63 = vpack.c.bf16 %v540_v60, %v538_v59  ;;  %v2349_v59 = vpack.c.bf16 %v1437_v57, %v1436_v26  ;;  %v1438_v60 = vld [vmem:[%s4327_s5 + $0x60] sm:$0xff] }
 0x11e   :  { %2240 = vmatpush1.bf16.msra.mxu0 %v2239_v4  ;;  %v2267_v4 = vpack.c.bf16 %v539_v1, %v537_v0  ;;  %v1440_v0 = vld [vmem:[%s4327_s5 + $0x70] sm:$0xff]  ;;  %v1441_v1 = vld [vmem:[%s4327_s5 + $0x78] sm:$0xff] }
 0x11f   :  { %2242 = vmatprep.subr.bf16.mxu0 %v2241_v8  ;;  %v546_v8 = vld [vmem:[%s4323_s1 + $0xfe8] sm:$0xff]  ;;  %v2355_v2 = vpack.c.bf16 %v1441_v1, %v1440_v0 }
 0x120   :  { %v2273_v10 = vpack.c.bf16 %v548_v9, %v546_v8 }
 0x122   :  { %2244 = vmatpush1.bf16.msra.mxu0 %v2243_v16 }
 0x123   :  { %2246 = vmatprep.subr.bf16.mxu0 %v2245_v19  ;;  %v2328_v19 = vpack.c.bf16 %v1345_v18, %v1344_v17 }
 0x125   :  { %2329 = vmatpush3.bf16.msra.mxu1 %v2328_v19 }
 0x126   :  { %2248 = vmatpush1.bf16.msra.mxu0 %v2247_v23  ;;  %2330 = vmatprep.subr.bf16.mxu1 %v2397_v5  ;;  %v581_v23 = vld [vmem:[%s4326_s2] sm:$0x3] }
 0x127   :  { %2250 = vmatprep.subr.bf16.mxu0 %v2249_v27  ;;  %v586_v11 = vrot.slane %v581_v23, %v585_v53  ;;  %v590_v27 = vrot.slane %v581_v23, %v589_v24 }
 0x12a   :  { %2252 = vmatpush1.bf16.msra.mxu0 %v2251_v35 }
 0x12b   :  { %2254 = vmatprep.subr.bf16.mxu0 %v2253_v38  ;;  %v1426_v38 = vld [vmem:[%s4327_s5] sm:$0xff] }
 0x12c   :  { %v2334_v41 = vpack.c.bf16 %v1427_v40, %v1426_v38 }
 0x12e   :  { %2256 = vmatpush1.bf16.msra.mxu0 %v2255_v44  ;;  %v1429_v44 = vld [vmem:[%s4327_s5 + $0x18] sm:$0xff] }
 0x12f   :  { %2258 = vmatprep.subr.bf16.mxu0 %v2257_v45  ;;  %v2337_v46 = vpack.c.bf16 %v1429_v44, %v1428_v43  ;;  %v1431_v45 = vld [vmem:[%s4327_s5 + $0x28] sm:$0xff] }
 0x130   :  { %v2340_v49 = vpack.c.bf16 %v1431_v45, %v1430_v47 }
 0x132   :  { %2260 = vmatpush1.bf16.msra.mxu0 %v2259_v55  ;;  %v1435_v55 = vld [vmem:[%s4327_s5 + $0x48] sm:$0xff] }
 0x133   :  { %2262 = vmatprep.subr.bf16.mxu0 %v2261_v56  ;;  %v2346_v56 = vpack.c.bf16 %v1435_v55, %v1434_v54 }
 0x136   :  { %2264 = vmatpush1.bf16.msra.mxu0 %v2263_v62  ;;  %v1439_v62 = vld [vmem:[%s4327_s5 + $0x68] sm:$0xff] }
 0x137   :  { %2266 = vmatprep.subr.bf16.mxu0 %v2265_v63  ;;  %v2352_v63 = vpack.c.bf16 %v1439_v62, %v1438_v60 }
 0x13a   :  { %2268 = vmatpush1.bf16.msra.mxu0 %v2267_v4  ;;  %v1520_v4 = vld [vmem:[%s4329_s7] sm:$0xff] }
 0x13b   :  { %2270 = vmatprep.subr.bf16.mxu0 %v2269_v6  ;;  %v1521_v6 = vld [vmem:[%s4329_s7 + $0x8] sm:$0xff] }
 0x13c   :  { %v2358_v9 = vpack.c.bf16 %v1521_v6, %v1520_v4 }
 0x13e   :  { %2272 = vmatpush1.bf16.msra.mxu0 %v2271_v48 }
 0x13f   :  { %2274 = vmatprep.subr.bf16.mxu0 %v2273_v10  ;;  %v1522_v10 = vld [vmem:[%s4329_s7 + $0x10] sm:$0xff]  ;;  %s2399_s7 = smov 32  }
 0x140   :  { %v2361_v13 = vpack.c.bf16 %v1523_v12, %v1522_v10 }
 0x142   :  { %2276 = vmatpush1.bf16.msra.mxu0 %v2275_v14  ;;  %v1642_v14 = vld [vmem:[%s4330_s6] ss:$0 sm:$0xff]  ;;  %s2400_s6 = smov 64  }
 0x145   :  { %1252 = vmatmul.mubr.f32.vlgmr.msra.gmra.mrb[0].mxu0 %v3980_v51  ;;  %v1347_v51 = vld [vmem:[%s4325_s3 + $0x78] sm:$0xff] }
 0x146   :  { %v2331_v52 = vpack.c.bf16 %v1347_v51, %v1346_v20 }
 0x148   :  { %2332 = vmatpush3.bf16.msra.mxu1 %v2331_v52 }
 0x149   :  { %2333 = vmatprep.subr.bf16.mxu1 %v2397_v5 }
 0x197   :  { %v898_v15 = vpop.f32.mrb[0].mxu1 }
 0x198   :  { %v900_v16 = vpop.f32.mrb[1].mxu1  ;;  %v2363_v28 = vadd.f32 %v898_v15, %v586_v11 }
 0x199   :  { %v2366_v29 = vadd.f32 %v900_v16, %v590_v27 }
 0x1b7   :  { %v1324_v21 = vpop.f32.mrb[2].mxu1 }
 0x1b8   :  { %v1326_v22 = vpop.f32.mrb[3].mxu1 }
 0x218   :  { %v1253_v32 = vpop.f32.mrb[0].mxu0 }
 0x219   :  { %v2364_v33 = vadd.f32 %v2363_v28, %v1253_v32  ;;  %v1255_v34 = vpop.f32.mrb[1].mxu0 }
 0x21a   :  { %v2367_v35 = vadd.f32 %v2366_v29, %v1255_v34 }
 0x21b   :  { %v2365_v36 = vadd.f32 %v2364_v33, %v1324_v21 }
 0x21c   :  { %v2368_v37 = vadd.f32 %v2367_v35, %v1326_v22 }
 0x21d   :  { %v1329_v58 = vmax.f32 %v2365_v36, 0.0 }
 0x21e   :  { %v1330_v61 = vmax.f32 %v2368_v37, 0.0 }
 0x220   :  { %v1331_v42 = vmax.f32 %v1329_v58, %v1330_v61 }
 0x222   :  { %1717 = vmatmul.mubr.f32.vlgmr.msra.gmra.mrb[4].mxu1 %v1331_v42 }
 0x223   :  { %2335 = vmatpush3.bf16.msra.mxu1 %v2334_v41  ;;  %1751 = vmatprep.mubr.msk.f32.mxu1 %vm2398_vm0, %v2396_v31 }
 0x224   :  { %2336 = vmatprep.subr.bf16.mxu1 %v2397_v5 }
 0x227   :  { %2338 = vmatpush3.bf16.msra.mxu1 %v2337_v46 }
 0x228   :  { %2339 = vmatprep.subr.bf16.mxu1 %v2397_v5 }
 0x22b   :  { %2341 = vmatpush3.bf16.msra.mxu1 %v2340_v49 }
 0x22c   :  { %2342 = vmatprep.subr.bf16.mxu1 %v2397_v5 }
 0x22f   :  { %2344 = vmatpush3.bf16.msra.mxu1 %v2343_v39 }
 0x230   :  { %2345 = vmatprep.subr.bf16.mxu1 %v2397_v5 }
 0x233   :  { %2347 = vmatpush3.bf16.msra.mxu1 %v2346_v56 }
 0x234   :  { %2348 = vmatprep.subr.bf16.mxu1 %v2397_v5 }
 0x237   :  { %2350 = vmatpush3.bf16.msra.mxu1 %v2349_v59 }
 0x238   :  { %2351 = vmatprep.subr.bf16.mxu1 %v2397_v5 }
 0x23b   :  { %2353 = vmatpush3.bf16.msra.mxu1 %v2352_v63 }
 0x23c   :  { %2354 = vmatprep.subr.bf16.mxu1 %v2397_v5 }
 0x23f   :  { %2356 = vmatpush3.bf16.msra.mxu1 %v2355_v2 }
 0x240   :  { %2357 = vmatprep.subr.bf16.mxu1 %v2397_v5 }
 0x2f5   :  { %v1421_v30 = vpop.f32.mrb[4].mxu1 }
 0x2f6   :  { %v1422_v7 = vadd.f32 %v1641_v3, %v1421_v30  ;;  %v1718_v8 = vpop.f32.mrb[5].mxu1 }
 0x2f8   :  { %v1425_v48 = vmax.f32 %v1422_v7, 0.0 }
 0x2fa   :  { %1752 = vmatmul.mubr.f32.vlgmr.msra.gmra.mrb[6].mxu1 %v1425_v48 }
 0x2fb   :  { %2359 = vmatpush3.bf16.msra.mxu1 %v2358_v9  ;;  %1762 = vmatprep.mubr.msk.f32.mxu1 %vm2398_vm0, %v2396_v31 }
 0x2fc   :  { %2360 = vmatprep.subr.bf16.mxu1 %v2397_v5  ;;  %v1643_v5 = vld [vmem:[%s4331_s8] ss:$0 sm:$0xff] }
 0x2ff   :  { %2362 = vmatpush3.bf16.msra.mxu1 %v2361_v13 }
 0x3cd   :  { %v1515_v15 = vpop.f32.mrb[6].mxu1 }
 0x3ce   :  { %v1516_v16 = vadd.f32 %v1642_v14, %v1515_v15  ;;  %v1753_v17 = vpop.f32.mrb[7].mxu1 }
 0x3d0   :  { %v1519_v31 = vmax.f32 %v1516_v16, 0.0 }
 0x3d2   :  { %1763 = vmatmul.mubr.msk.f32.vlgmr.msra.gmra.mrb[8].mxu1 %vm1531_vm1, %v1519_v31 }
 0x4a5   :  { %v1601_v18 = vpop.f32.mrb[8].mxu1 }
 0x4a6   :  { %v1602_v19 = vadd.f32 %v1643_v5, %v1601_v18  ;;  %v1764_v20 = vpop.f32.mrb[9].mxu1 }
 0x4a8   :  { %1620 = vrot.lane.b32.xlu1 %v1602_v19, %s2399_s7  ;;  %v1606_v51 = vsel %vm1605_vm2, %v1602_v19, -inf }
 0x4a9   :  { %1607 = vmax.xlane.f32.xlu0 %v1606_v51 }
 0x4ac   :  { %1623 = vrot.lane.b32.xlu1 %v1519_v31, %s2400_s6 }
 0x51a   :  { %v1621_v28 = vpop.permute.xlu1 %1620 }
 0x51e   :  { %v1624_v35 = vpop.permute.xlu1 %1623 }
 0x536   :  { %v1608_v52 = vpop.xlane.xlu0 %1607 }
 0x537   :  { %v1609_v21 = vsub.f32 %v1602_v19, %v1608_v52 }
 0x539   :  { %v1610_v22 = vmul.f32 1.442695, %v1609_v21 }
 0x53b   :  { %2391 = vpow2.f32 %v1610_v22 }
 0x545   :  { %v2392_v53 = vpop.eup %2391 }
 0x546   :  { %v1612_v23 = vsel %vm1605_vm2, %v2392_v53, 0.0 }
 0x547   :  { %1613 = vadd.xlane.f32.xlu0 %v1612_v23 }
 0x5d4   :  { %v1614_v24 = vpop.xlane.xlu0 %1613 }
 0x5d5   :  { %2393 = vlog2.f32 %v1614_v24 }
 0x5df   :  { %v2394_v11 = vpop.eup %2393 }
 0x5e0   :  { %v1616_v27 = vmul.f32 0.6931472, %v2394_v11 }
 0x5e2   :  { %v1617_v29 = vadd.f32 %v1616_v27, %v1608_v52 }
 0x5e4   :  { %v1618_v32 = vsub.f32 %v1602_v19, %v1617_v29 }
 0x5e6   :  { %v1627_v33 = vsel %vm1626_vm3, %v1618_v32, 0.0 }
 0x5e7   :  { %v1628_v34 = vsel %vm1531_vm1, %v1627_v33, %v1621_v28 }
 0x5e8   :  { %v1630_v36 = vsel %vm1629_vm4, %v1628_v34, 0.0 }
 0x5e9   :  { %v1632_v37 = vsel %vm1631_vm5, %v1630_v36, %v1624_v35 }
 0x5ea   :  { %v1634_v38 = vsel %vm1633_vm6, %v1632_v37, 0.0 }
 0x5eb   :  { %1635 = vst [vmem:[%s4332_s9] sm:$0x3] %v1634_v38 }

</bundles_post_ra>
